<compile_context>
chip_gen: v7x
topology: tpu7x:2x2x1
jax: 0.10.0
libtpu: 0.0.40
codegen_flags: <defaults>
</compile_context>

<pallas_src>
import jax
import jax.numpy as jnp
from jax import lax
from jax.experimental import pallas as pl
from jax.experimental.pallas import tpu as pltpu

NEG_SLOPE = 0.2
BN_EPS = 1e-5
MASK_NEG = -1e30


def _full_spec(shape):
    zeros = (0,) * len(shape)
    return pl.BlockSpec(shape, lambda *_a, _z=zeros: _z)


# ------------------------------------------------------------------ kernel
def make_fused_kernel(layer_cfg, n_fixed=10):
    """layer_cfg: tuple of (heads, out_c, residual) per GAT layer (static)."""

    def kernel(*refs):
        (x_ref, emb_w_ref, emb_b_ref, mask_ref, rowv_ref,
         pool_ref, l1w_ref, l1b_ref, l2w_ref, l2b_ref) = refs[:n_fixed]
        layer_refs = refs[n_fixed:-1]
        o_ref = refs[-1]

        mask = mask_ref[...]     # (N, N) additive bias: 0 on edges, -1e30 off
        rowv = rowv_ref[...]     # (N, 1) 1.0 iff node has >= 1 incoming edge

        # embedding: nn.Linear on cat(x, pos)
        h = jnp.dot(x_ref[...], emb_w_ref[...],
                    preferred_element_type=jnp.float32) + emb_b_ref[...]

        idx = 0
        for heads, out_c, residual in layer_cfg:
            lin_w = layer_refs[idx][...]
            lin_b = layer_refs[idx + 1][...]
            a_dst_mat = layer_refs[idx + 2][...]   # (H*C, H) block-diag dst proj
            a_src_mat = layer_refs[idx + 3][...]   # (H, H*C) block-diag src proj
            scale = layer_refs[idx + 4][...]       # (1, F) BN scale
            shift = layer_refs[idx + 5][...]       # (1, F) conv bias + BN shift
            idx += 6

            # qGATConv.lin
            fea = jnp.dot(h, lin_w, preferred_element_type=jnp.float32) + lin_b

            # all heads' attention scores with two small matmuls (no per-head
            # cross-lane reductions, no (N,1)->(1,N) transposes)
            a_dst_all = jnp.dot(fea, a_dst_mat,
                                preferred_element_type=jnp.float32)   # (N, H)
            a_src_all = lax.dot_general(a_src_mat, fea,
                                        (((1,), (1,)), ((), ())),
                                        preferred_element_type=jnp.float32)  # (H, N)

            head_outs = []
            for hh in range(heads):
                fea_h = fea[:, hh * out_c:(hh + 1) * out_c]            # (N, C)
                s = a_dst_all[:, hh:hh + 1] + a_src_all[hh:hh + 1, :]  # (N, N)
                s = jnp.maximum(s, NEG_SLOPE * s)                      # leaky_relu
                s = s + mask                                           # edge mask
                m = jnp.max(s, axis=1, keepdims=True)
                e = jnp.exp(s - m)
                denom = jnp.sum(e, axis=1, keepdims=True)
                alpha = e * pl.reciprocal(denom, approx=True)          # softmax
                # scatter-add aggregation == dense matmul with attention matrix
                head_outs.append(jnp.dot(alpha, fea_h,
                                         preferred_element_type=jnp.float32))
            aggr = head_outs[0] if heads == 1 else jnp.concatenate(head_outs,
                                                                   axis=1)
            aggr = aggr * rowv                  # isolated destinations -> 0
            y = aggr * scale + shift            # conv bias + eval-mode BatchNorm
            y = jnp.maximum(y, 0.0)             # ReLU
            h = y + h if residual else y        # residual (static branch)

        # global_mean_pool (as matmul with averaging matrix) + lin1 -> ReLU -> lin2
        pooled = jnp.dot(pool_ref[...], h, preferred_element_type=jnp.float32)
        z = jnp.dot(pooled, l1w_ref[...],
                    preferred_element_type=jnp.float32) + l1b_ref[...]
        z = jnp.maximum(z, 0.0)
        o_ref[...] = jnp.dot(z, l2w_ref[...],
                             preferred_element_type=jnp.float32) + l2b_ref[...]

    return kernel


# ------------------------------------------------------------------ model
def gat_forward(x, pos, adj, pool_mat, params):
    # x: (N, Fx), pos: (N, Fp)  -> concat along features (torch.cat dim=1)
    h0 = jnp.concatenate([x, pos], axis=1).astype(jnp.float32)
    # precompute additive edge-mask bias and row-validity once per forward
    mask_bias = jnp.where(adj > 0, 0.0, MASK_NEG).astype(jnp.float32)
    row_valid = (jnp.sum(adj, axis=1, keepdims=True) > 0).astype(jnp.float32)

    inputs = [
        h0,
        params["emb_w"], params["emb_b"].reshape(1, -1),
        mask_bias, row_valid,
        pool_mat,
        params["lin1_w"], params["lin1_b"].reshape(1, -1),
        params["lin2_w"], params["lin2_b"].reshape(1, -1),
    ]
    layer_cfg = []
    for layer in params["layers"]:
        heads, out_c = layer["heads"], layer["out_c"]
        # fold conv bias into eval-mode BatchNorm affine:
        #   ((aggr + b) - rm)/sqrt(rv+eps)*gamma + beta = aggr*scale + shift
        scale = layer["bn_gamma"] / jnp.sqrt(layer["bn_var"] + BN_EPS)
        shift = (layer["conv_bias"] - layer["bn_mean"]) * scale + layer["bn_beta"]
        att = layer["att"]                     # (1, H, 2C)
        attd = att[0, :, :out_c]               # (H, C) destination coefficients
        atts = att[0, :, out_c:]               # (H, C) source coefficients
        eye_h = jnp.eye(heads, dtype=jnp.float32)
        # block-diagonal projections so all heads' scores are 2 matmuls:
        #   a_dst_mat[h*C + c, h] = attd[h, c]     -> fea @ a_dst_mat : (N, H)
        #   a_src_mat[h, h*C + c] = atts[h, c]     -> contract with fea: (H, N)
        a_dst_mat = (attd[:, :, None] * eye_h[:, None, :]).reshape(
            heads * out_c, heads)
        a_src_mat = (atts[:, None, :] * eye_h[:, :, None]).reshape(
            heads, heads * out_c)
        inputs += [
            layer["lin_w"], layer["lin_b"].reshape(1, -1),
            a_dst_mat, a_src_mat,
            scale.reshape(1, -1), shift.reshape(1, -1),
        ]
        layer_cfg.append((heads, out_c, bool(layer["residual"])))

    b = pool_mat.shape[0]
    num_classes = params["lin2_w"].shape[1]
    kernel = make_fused_kernel(tuple(layer_cfg))
    logits = pl.pallas_call(
        kernel,
        out_shape=jax.ShapeDtypeStruct((b, num_classes), jnp.float32),
        in_specs=[_full_spec(tuple(a.shape)) for a in inputs],
        out_specs=_full_spec((b, num_classes)),
        compiler_params=pltpu.CompilerParams(
            vmem_limit_bytes=32 * 1024 * 1024),
    )(*inputs)
    bit_sum = jnp.zeros((1,), jnp.float32)     # is_q=False -> stays zero
    return logits, bit_sum


def init_params(key, in_feat, hidden, heads, out_dim, num_layers, num_classes):
    keys = iter(jax.random.split(key, 64))

    def nrm(shape, std=0.1):
        return (std * jax.random.normal(next(keys), shape)).astype(jnp.float32)

    params = {
        "emb_w": nrm((in_feat, hidden * heads)),
        "emb_b": nrm((hidden * heads,)),
        "layers": [],
        "lin1_w": nrm((out_dim, out_dim)),
        "lin1_b": nrm((out_dim,)),
        "lin2_w": nrm((out_dim, num_classes)),
        "lin2_b": nrm((num_classes,)),
    }
    layer_cfg = [(hidden * heads, hidden, heads)] * (num_layers - 1) \
        + [(hidden * heads, out_dim, 1)]
    for in_dim, oc, h in layer_cfg:
        f = oc * h
        params["layers"].append({
            "heads": h,
            "out_c": oc,
            "residual": in_dim == f,
            "lin_w": nrm((in_dim, f)),
            "lin_b": nrm((f,)),
            "att": nrm((1, h, 2 * oc)),
            "conv_bias": nrm((f,)),
            "bn_gamma": jnp.ones((f,), jnp.float32) + nrm((f,), 0.05),
            "bn_beta": nrm((f,), 0.05),
            "bn_mean": jnp.zeros((f,), jnp.float32),
            "bn_var": jnp.ones((f,), jnp.float32),
        })
    return params


# ------------------------------------------------------------------ main
if __name__ == "__main__":
    # Small MNIST-superpixel-like problem:
    #   2 graphs x 32 nodes, node feature dim 1, pos dim 2, 10 classes.
    B, NODES_PER_GRAPH = 2, 32
    N = B * NODES_PER_GRAPH
    FX, FP = 1, 2
    HIDDEN, HEADS, OUT_DIM, NUM_LAYERS, NUM_CLASSES = 16, 2, 32, 3, 10

    key = jax.random.PRNGKey(0)
    kx, kp, kparam = jax.random.split(key, 3)
    x = jax.random.normal(kx, (N, FX), dtype=jnp.float32)
    pos = jax.random.normal(kp, (N, FP), dtype=jnp.float32)

    # deterministic graph: bidirectional ring inside each graph (no self loops)
    eye = jnp.eye(NODES_PER_GRAPH, dtype=jnp.float32)
    ring = jnp.roll(eye, 1, axis=1) + jnp.roll(eye, -1, axis=1)
    adj = jnp.zeros((N, N), jnp.float32)
    adj = adj.at[:NODES_PER_GRAPH, :NODES_PER_GRAPH].set(ring)
    adj = adj.at[NODES_PER_GRAPH:, NODES_PER_GRAPH:].set(ring)

    # global_mean_pool matrix: pool_mat[g, n] = 1/|graph g| if node n in graph g
    batch = jnp.repeat(jnp.arange(B), NODES_PER_GRAPH)
    pool_mat = (jax.nn.one_hot(batch, B, dtype=jnp.float32).T
                / float(NODES_PER_GRAPH))

    params = init_params(kparam, FX + FP, HIDDEN, HEADS, OUT_DIM,
                         NUM_LAYERS, NUM_CLASSES)

    logits, bit_sum = gat_forward(x, pos, adj, pool_mat, params)
    jax.block_until_ready(logits)
    assert logits.shape == (B, NUM_CLASSES)
    assert bool(jnp.all(jnp.isfinite(logits)))
    print("KERNEL_OK")
</pallas_src>

<mosaic_0001>
module attributes {stable_mosaic.version = 11 : i64} {
  func.func @kernel(%arg0: memref<64x3xf32, #tpu.memory_space<vmem>>, %arg1: memref<3x32xf32, #tpu.memory_space<vmem>>, %arg2: memref<1x32xf32, #tpu.memory_space<vmem>>, %arg3: memref<64x64xf32, #tpu.memory_space<vmem>>, %arg4: memref<64x1xf32, #tpu.memory_space<vmem>>, %arg5: memref<2x64xf32, #tpu.memory_space<vmem>>, %arg6: memref<32x32xf32, #tpu.memory_space<vmem>>, %arg7: memref<1x32xf32, #tpu.memory_space<vmem>>, %arg8: memref<32x10xf32, #tpu.memory_space<vmem>>, %arg9: memref<1x10xf32, #tpu.memory_space<vmem>>, %arg10: memref<32x32xf32, #tpu.memory_space<vmem>>, %arg11: memref<1x32xf32, #tpu.memory_space<vmem>>, %arg12: memref<32x2xf32, #tpu.memory_space<vmem>>, %arg13: memref<2x32xf32, #tpu.memory_space<vmem>>, %arg14: memref<1x32xf32, #tpu.memory_space<vmem>>, %arg15: memref<1x32xf32, #tpu.memory_space<vmem>>, %arg16: memref<32x32xf32, #tpu.memory_space<vmem>>, %arg17: memref<1x32xf32, #tpu.memory_space<vmem>>, %arg18: memref<32x2xf32, #tpu.memory_space<vmem>>, %arg19: memref<2x32xf32, #tpu.memory_space<vmem>>, %arg20: memref<1x32xf32, #tpu.memory_space<vmem>>, %arg21: memref<1x32xf32, #tpu.memory_space<vmem>>, %arg22: memref<32x32xf32, #tpu.memory_space<vmem>>, %arg23: memref<1x32xf32, #tpu.memory_space<vmem>>, %arg24: memref<32x1xf32, #tpu.memory_space<vmem>>, %arg25: memref<1x32xf32, #tpu.memory_space<vmem>>, %arg26: memref<1x32xf32, #tpu.memory_space<vmem>>, %arg27: memref<1x32xf32, #tpu.memory_space<vmem>>, %arg28: memref<2x10xf32, #tpu.memory_space<vmem>>) attributes {dimension_semantics = [], scalar_prefetch = 0 : i64, scratch_operands = 0 : i64, tpu.core_type = #tpu.core_type<tc>} {
    %c0 = arith.constant 0 : index
    %c0_0 = arith.constant 0 : index
    %0 = vector.load %arg3[%c0, %c0_0] : memref<64x64xf32, #tpu.memory_space<vmem>>, vector<64x64xf32>
    %c0_1 = arith.constant 0 : index
    %c0_2 = arith.constant 0 : index
    %1 = vector.load %arg4[%c0_1, %c0_2] : memref<64x1xf32, #tpu.memory_space<vmem>>, vector<64x1xf32>
    %c0_3 = arith.constant 0 : index
    %c0_4 = arith.constant 0 : index
    %2 = vector.load %arg0[%c0_3, %c0_4] : memref<64x3xf32, #tpu.memory_space<vmem>>, vector<64x3xf32>
    %c0_5 = arith.constant 0 : index
    %c0_6 = arith.constant 0 : index
    %3 = vector.load %arg1[%c0_5, %c0_6] : memref<3x32xf32, #tpu.memory_space<vmem>>, vector<3x32xf32>
    %cst = arith.constant dense<0.000000e+00> : vector<64x32xf32>
    %4 = tpu.matmul %2, %3, %cst {dimension_numbers = #tpu.dot_dimension_numbers<[1], [0], [0], [1], [0, 0, 1, 1], [], []>} : vector<64x3xf32>, vector<3x32xf32>, vector<64x32xf32> -> vector<64x32xf32>
    %c0_7 = arith.constant 0 : index
    %c0_8 = arith.constant 0 : index
    %5 = vector.load %arg2[%c0_7, %c0_8] : memref<1x32xf32, #tpu.memory_space<vmem>>, vector<1x32xf32>
    %6 = vector.broadcast %5 : vector<1x32xf32> to vector<64x32xf32>
    %7 = arith.addf %4, %6 : vector<64x32xf32>
    %c0_9 = arith.constant 0 : index
    %c0_10 = arith.constant 0 : index
    %8 = vector.load %arg10[%c0_9, %c0_10] : memref<32x32xf32, #tpu.memory_space<vmem>>, vector<32x32xf32>
    %c0_11 = arith.constant 0 : index
    %c0_12 = arith.constant 0 : index
    %9 = vector.load %arg11[%c0_11, %c0_12] : memref<1x32xf32, #tpu.memory_space<vmem>>, vector<1x32xf32>
    %c0_13 = arith.constant 0 : index
    %c0_14 = arith.constant 0 : index
    %10 = vector.load %arg12[%c0_13, %c0_14] : memref<32x2xf32, #tpu.memory_space<vmem>>, vector<32x2xf32>
    %c0_15 = arith.constant 0 : index
    %c0_16 = arith.constant 0 : index
    %11 = vector.load %arg13[%c0_15, %c0_16] : memref<2x32xf32, #tpu.memory_space<vmem>>, vector<2x32xf32>
    %c0_17 = arith.constant 0 : index
    %c0_18 = arith.constant 0 : index
    %12 = vector.load %arg14[%c0_17, %c0_18] : memref<1x32xf32, #tpu.memory_space<vmem>>, vector<1x32xf32>
    %c0_19 = arith.constant 0 : index
    %c0_20 = arith.constant 0 : index
    %13 = vector.load %arg15[%c0_19, %c0_20] : memref<1x32xf32, #tpu.memory_space<vmem>>, vector<1x32xf32>
    %cst_21 = arith.constant dense<0.000000e+00> : vector<64x32xf32>
    %14 = tpu.matmul %7, %8, %cst_21 {dimension_numbers = #tpu.dot_dimension_numbers<[1], [0], [0], [1], [0, 0, 1, 1], [], []>} : vector<64x32xf32>, vector<32x32xf32>, vector<64x32xf32> -> vector<64x32xf32>
    %15 = vector.broadcast %9 : vector<1x32xf32> to vector<64x32xf32>
    %16 = arith.addf %14, %15 : vector<64x32xf32>
    %cst_22 = arith.constant dense<0.000000e+00> : vector<64x2xf32>
    %17 = tpu.matmul %16, %10, %cst_22 {dimension_numbers = #tpu.dot_dimension_numbers<[1], [0], [0], [1], [0, 0, 1, 1], [], []>} : vector<64x32xf32>, vector<32x2xf32>, vector<64x2xf32> -> vector<64x2xf32>
    %cst_23 = arith.constant dense<0.000000e+00> : vector<2x64xf32>
    %18 = tpu.matmul %11, %16, %cst_23 {dimension_numbers = #tpu.dot_dimension_numbers<[1], [1], [0], [0], [0, 0, 1, 0], [], []>} : vector<2x32xf32>, vector<64x32xf32>, vector<2x64xf32> -> vector<2x64xf32>
    %19 = vector.extract_strided_slice %16 {offsets = [0, 0], sizes = [64, 16], strides = [1, 1]} : vector<64x32xf32> to vector<64x16xf32>
    %20 = vector.extract_strided_slice %17 {offsets = [0, 0], sizes = [64, 1], strides = [1, 1]} : vector<64x2xf32> to vector<64x1xf32>
    %21 = vector.extract_strided_slice %18 {offsets = [0, 0], sizes = [1, 64], strides = [1, 1]} : vector<2x64xf32> to vector<1x64xf32>
    %22 = vector.broadcast %20 : vector<64x1xf32> to vector<64x64xf32>
    %23 = vector.broadcast %21 : vector<1x64xf32> to vector<64x64xf32>
    %24 = arith.addf %22, %23 : vector<64x64xf32>
    %cst_24 = arith.constant 2.000000e-01 : f32
    %25 = vector.broadcast %cst_24 : f32 to vector<64x64xf32>
    %26 = arith.mulf %25, %24 : vector<64x64xf32>
    %27 = arith.maximumf %24, %26 : vector<64x64xf32>
    %28 = arith.addf %27, %0 : vector<64x64xf32>
    %cst_25 = arith.constant dense<0xFF800000> : vector<64xf32>
    %29 = vector.multi_reduction <maximumf>, %28, %cst_25 [1] : vector<64x64xf32> to vector<64xf32>
    %30 = vector.shape_cast %29 : vector<64xf32> to vector<64x1xf32>
    %31 = vector.broadcast %30 : vector<64x1xf32> to vector<64x64xf32>
    %32 = arith.subf %28, %31 : vector<64x64xf32>
    %33 = math.exp %32 : vector<64x64xf32>
    %cst_26 = arith.constant dense<0.000000e+00> : vector<64xf32>
    %34 = vector.multi_reduction <add>, %33, %cst_26 [1] : vector<64x64xf32> to vector<64xf32>
    %35 = vector.shape_cast %34 : vector<64xf32> to vector<64x1xf32>
    %36 = tpu.reciprocal %35 {approx = true} : vector<64x1xf32> -> vector<64x1xf32>
    %37 = vector.broadcast %36 : vector<64x1xf32> to vector<64x64xf32>
    %38 = arith.mulf %33, %37 : vector<64x64xf32>
    %cst_27 = arith.constant dense<0.000000e+00> : vector<64x16xf32>
    %39 = tpu.matmul %38, %19, %cst_27 {dimension_numbers = #tpu.dot_dimension_numbers<[1], [0], [0], [1], [0, 0, 1, 1], [], []>} : vector<64x64xf32>, vector<64x16xf32>, vector<64x16xf32> -> vector<64x16xf32>
    %40 = vector.extract_strided_slice %16 {offsets = [0, 16], sizes = [64, 16], strides = [1, 1]} : vector<64x32xf32> to vector<64x16xf32>
    %41 = vector.extract_strided_slice %17 {offsets = [0, 1], sizes = [64, 1], strides = [1, 1]} : vector<64x2xf32> to vector<64x1xf32>
    %42 = vector.extract_strided_slice %18 {offsets = [1, 0], sizes = [1, 64], strides = [1, 1]} : vector<2x64xf32> to vector<1x64xf32>
    %43 = vector.broadcast %41 : vector<64x1xf32> to vector<64x64xf32>
    %44 = vector.broadcast %42 : vector<1x64xf32> to vector<64x64xf32>
    %45 = arith.addf %43, %44 : vector<64x64xf32>
    %cst_28 = arith.constant 2.000000e-01 : f32
    %46 = vector.broadcast %cst_28 : f32 to vector<64x64xf32>
    %47 = arith.mulf %46, %45 : vector<64x64xf32>
    %48 = arith.maximumf %45, %47 : vector<64x64xf32>
    %49 = arith.addf %48, %0 : vector<64x64xf32>
    %cst_29 = arith.constant dense<0xFF800000> : vector<64xf32>
    %50 = vector.multi_reduction <maximumf>, %49, %cst_29 [1] : vector<64x64xf32> to vector<64xf32>
    %51 = vector.shape_cast %50 : vector<64xf32> to vector<64x1xf32>
    %52 = vector.broadcast %51 : vector<64x1xf32> to vector<64x64xf32>
    %53 = arith.subf %49, %52 : vector<64x64xf32>
    %54 = math.exp %53 : vector<64x64xf32>
    %cst_30 = arith.constant dense<0.000000e+00> : vector<64xf32>
    %55 = vector.multi_reduction <add>, %54, %cst_30 [1] : vector<64x64xf32> to vector<64xf32>
    %56 = vector.shape_cast %55 : vector<64xf32> to vector<64x1xf32>
    %57 = tpu.reciprocal %56 {approx = true} : vector<64x1xf32> -> vector<64x1xf32>
    %58 = vector.broadcast %57 : vector<64x1xf32> to vector<64x64xf32>
    %59 = arith.mulf %54, %58 : vector<64x64xf32>
    %cst_31 = arith.constant dense<0.000000e+00> : vector<64x16xf32>
    %60 = tpu.matmul %59, %40, %cst_31 {dimension_numbers = #tpu.dot_dimension_numbers<[1], [0], [0], [1], [0, 0, 1, 1], [], []>} : vector<64x64xf32>, vector<64x16xf32>, vector<64x16xf32> -> vector<64x16xf32>
    %61 = tpu.concatenate %39, %60 in 1 : vector<64x16xf32>, vector<64x16xf32> -> vector<64x32xf32>
    %62 = vector.broadcast %1 : vector<64x1xf32> to vector<64x32xf32>
    %63 = arith.mulf %61, %62 : vector<64x32xf32>
    %64 = vector.broadcast %12 : vector<1x32xf32> to vector<64x32xf32>
    %65 = arith.mulf %63, %64 : vector<64x32xf32>
    %66 = vector.broadcast %13 : vector<1x32xf32> to vector<64x32xf32>
    %67 = arith.addf %65, %66 : vector<64x32xf32>
    %cst_32 = arith.constant 0.000000e+00 : f32
    %68 = vector.broadcast %cst_32 : f32 to vector<64x32xf32>
    %69 = arith.maximumf %67, %68 : vector<64x32xf32>
    %70 = arith.addf %69, %7 : vector<64x32xf32>
    %c0_33 = arith.constant 0 : index
    %c0_34 = arith.constant 0 : index
    %71 = vector.load %arg16[%c0_33, %c0_34] : memref<32x32xf32, #tpu.memory_space<vmem>>, vector<32x32xf32>
    %c0_35 = arith.constant 0 : index
    %c0_36 = arith.constant 0 : index
    %72 = vector.load %arg17[%c0_35, %c0_36] : memref<1x32xf32, #tpu.memory_space<vmem>>, vector<1x32xf32>
    %c0_37 = arith.constant 0 : index
    %c0_38 = arith.constant 0 : index
    %73 = vector.load %arg18[%c0_37, %c0_38] : memref<32x2xf32, #tpu.memory_space<vmem>>, vector<32x2xf32>
    %c0_39 = arith.constant 0 : index
    %c0_40 = arith.constant 0 : index
    %74 = vector.load %arg19[%c0_39, %c0_40] : memref<2x32xf32, #tpu.memory_space<vmem>>, vector<2x32xf32>
    %c0_41 = arith.constant 0 : index
    %c0_42 = arith.constant 0 : index
    %75 = vector.load %arg20[%c0_41, %c0_42] : memref<1x32xf32, #tpu.memory_space<vmem>>, vector<1x32xf32>
    %c0_43 = arith.constant 0 : index
    %c0_44 = arith.constant 0 : index
    %76 = vector.load %arg21[%c0_43, %c0_44] : memref<1x32xf32, #tpu.memory_space<vmem>>, vector<1x32xf32>
    %cst_45 = arith.constant dense<0.000000e+00> : vector<64x32xf32>
    %77 = tpu.matmul %70, %71, %cst_45 {dimension_numbers = #tpu.dot_dimension_numbers<[1], [0], [0], [1], [0, 0, 1, 1], [], []>} : vector<64x32xf32>, vector<32x32xf32>, vector<64x32xf32> -> vector<64x32xf32>
    %78 = vector.broadcast %72 : vector<1x32xf32> to vector<64x32xf32>
    %79 = arith.addf %77, %78 : vector<64x32xf32>
    %cst_46 = arith.constant dense<0.000000e+00> : vector<64x2xf32>
    %80 = tpu.matmul %79, %73, %cst_46 {dimension_numbers = #tpu.dot_dimension_numbers<[1], [0], [0], [1], [0, 0, 1, 1], [], []>} : vector<64x32xf32>, vector<32x2xf32>, vector<64x2xf32> -> vector<64x2xf32>
    %cst_47 = arith.constant dense<0.000000e+00> : vector<2x64xf32>
    %81 = tpu.matmul %74, %79, %cst_47 {dimension_numbers = #tpu.dot_dimension_numbers<[1], [1], [0], [0], [0, 0, 1, 0], [], []>} : vector<2x32xf32>, vector<64x32xf32>, vector<2x64xf32> -> vector<2x64xf32>
    %82 = vector.extract_strided_slice %79 {offsets = [0, 0], sizes = [64, 16], strides = [1, 1]} : vector<64x32xf32> to vector<64x16xf32>
    %83 = vector.extract_strided_slice %80 {offsets = [0, 0], sizes = [64, 1], strides = [1, 1]} : vector<64x2xf32> to vector<64x1xf32>
    %84 = vector.extract_strided_slice %81 {offsets = [0, 0], sizes = [1, 64], strides = [1, 1]} : vector<2x64xf32> to vector<1x64xf32>
    %85 = vector.broadcast %83 : vector<64x1xf32> to vector<64x64xf32>
    %86 = vector.broadcast %84 : vector<1x64xf32> to vector<64x64xf32>
    %87 = arith.addf %85, %86 : vector<64x64xf32>
    %cst_48 = arith.constant 2.000000e-01 : f32
    %88 = vector.broadcast %cst_48 : f32 to vector<64x64xf32>
    %89 = arith.mulf %88, %87 : vector<64x64xf32>
    %90 = arith.maximumf %87, %89 : vector<64x64xf32>
    %91 = arith.addf %90, %0 : vector<64x64xf32>
    %cst_49 = arith.constant dense<0xFF800000> : vector<64xf32>
    %92 = vector.multi_reduction <maximumf>, %91, %cst_49 [1] : vector<64x64xf32> to vector<64xf32>
    %93 = vector.shape_cast %92 : vector<64xf32> to vector<64x1xf32>
    %94 = vector.broadcast %93 : vector<64x1xf32> to vector<64x64xf32>
    %95 = arith.subf %91, %94 : vector<64x64xf32>
    %96 = math.exp %95 : vector<64x64xf32>
    %cst_50 = arith.constant dense<0.000000e+00> : vector<64xf32>
    %97 = vector.multi_reduction <add>, %96, %cst_50 [1] : vector<64x64xf32> to vector<64xf32>
    %98 = vector.shape_cast %97 : vector<64xf32> to vector<64x1xf32>
    %99 = tpu.reciprocal %98 {approx = true} : vector<64x1xf32> -> vector<64x1xf32>
    %100 = vector.broadcast %99 : vector<64x1xf32> to vector<64x64xf32>
    %101 = arith.mulf %96, %100 : vector<64x64xf32>
    %cst_51 = arith.constant dense<0.000000e+00> : vector<64x16xf32>
    %102 = tpu.matmul %101, %82, %cst_51 {dimension_numbers = #tpu.dot_dimension_numbers<[1], [0], [0], [1], [0, 0, 1, 1], [], []>} : vector<64x64xf32>, vector<64x16xf32>, vector<64x16xf32> -> vector<64x16xf32>
    %103 = vector.extract_strided_slice %79 {offsets = [0, 16], sizes = [64, 16], strides = [1, 1]} : vector<64x32xf32> to vector<64x16xf32>
    %104 = vector.extract_strided_slice %80 {offsets = [0, 1], sizes = [64, 1], strides = [1, 1]} : vector<64x2xf32> to vector<64x1xf32>
    %105 = vector.extract_strided_slice %81 {offsets = [1, 0], sizes = [1, 64], strides = [1, 1]} : vector<2x64xf32> to vector<1x64xf32>
    %106 = vector.broadcast %104 : vector<64x1xf32> to vector<64x64xf32>
    %107 = vector.broadcast %105 : vector<1x64xf32> to vector<64x64xf32>
    %108 = arith.addf %106, %107 : vector<64x64xf32>
    %cst_52 = arith.constant 2.000000e-01 : f32
    %109 = vector.broadcast %cst_52 : f32 to vector<64x64xf32>
    %110 = arith.mulf %109, %108 : vector<64x64xf32>
    %111 = arith.maximumf %108, %110 : vector<64x64xf32>
    %112 = arith.addf %111, %0 : vector<64x64xf32>
    %cst_53 = arith.constant dense<0xFF800000> : vector<64xf32>
    %113 = vector.multi_reduction <maximumf>, %112, %cst_53 [1] : vector<64x64xf32> to vector<64xf32>
    %114 = vector.shape_cast %113 : vector<64xf32> to vector<64x1xf32>
    %115 = vector.broadcast %114 : vector<64x1xf32> to vector<64x64xf32>
    %116 = arith.subf %112, %115 : vector<64x64xf32>
    %117 = math.exp %116 : vector<64x64xf32>
    %cst_54 = arith.constant dense<0.000000e+00> : vector<64xf32>
    %118 = vector.multi_reduction <add>, %117, %cst_54 [1] : vector<64x64xf32> to vector<64xf32>
    %119 = vector.shape_cast %118 : vector<64xf32> to vector<64x1xf32>
    %120 = tpu.reciprocal %119 {approx = true} : vector<64x1xf32> -> vector<64x1xf32>
    %121 = vector.broadcast %120 : vector<64x1xf32> to vector<64x64xf32>
    %122 = arith.mulf %117, %121 : vector<64x64xf32>
    %cst_55 = arith.constant dense<0.000000e+00> : vector<64x16xf32>
    %123 = tpu.matmul %122, %103, %cst_55 {dimension_numbers = #tpu.dot_dimension_numbers<[1], [0], [0], [1], [0, 0, 1, 1], [], []>} : vector<64x64xf32>, vector<64x16xf32>, vector<64x16xf32> -> vector<64x16xf32>
    %124 = tpu.concatenate %102, %123 in 1 : vector<64x16xf32>, vector<64x16xf32> -> vector<64x32xf32>
    %125 = vector.broadcast %1 : vector<64x1xf32> to vector<64x32xf32>
    %126 = arith.mulf %124, %125 : vector<64x32xf32>
    %127 = vector.broadcast %75 : vector<1x32xf32> to vector<64x32xf32>
    %128 = arith.mulf %126, %127 : vector<64x32xf32>
    %129 = vector.broadcast %76 : vector<1x32xf32> to vector<64x32xf32>
    %130 = arith.addf %128, %129 : vector<64x32xf32>
    %cst_56 = arith.constant 0.000000e+00 : f32
    %131 = vector.broadcast %cst_56 : f32 to vector<64x32xf32>
    %132 = arith.maximumf %130, %131 : vector<64x32xf32>
    %133 = arith.addf %132, %70 : vector<64x32xf32>
    %c0_57 = arith.constant 0 : index
    %c0_58 = arith.constant 0 : index
    %134 = vector.load %arg22[%c0_57, %c0_58] : memref<32x32xf32, #tpu.memory_space<vmem>>, vector<32x32xf32>
    %c0_59 = arith.constant 0 : index
    %c0_60 = arith.constant 0 : index
    %135 = vector.load %arg23[%c0_59, %c0_60] : memref<1x32xf32, #tpu.memory_space<vmem>>, vector<1x32xf32>
    %c0_61 = arith.constant 0 : index
    %c0_62 = arith.constant 0 : index
    %136 = vector.load %arg24[%c0_61, %c0_62] : memref<32x1xf32, #tpu.memory_space<vmem>>, vector<32x1xf32>
    %c0_63 = arith.constant 0 : index
    %c0_64 = arith.constant 0 : index
    %137 = vector.load %arg25[%c0_63, %c0_64] : memref<1x32xf32, #tpu.memory_space<vmem>>, vector<1x32xf32>
    %c0_65 = arith.constant 0 : index
    %c0_66 = arith.constant 0 : index
    %138 = vector.load %arg26[%c0_65, %c0_66] : memref<1x32xf32, #tpu.memory_space<vmem>>, vector<1x32xf32>
    %c0_67 = arith.constant 0 : index
    %c0_68 = arith.constant 0 : index
    %139 = vector.load %arg27[%c0_67, %c0_68] : memref<1x32xf32, #tpu.memory_space<vmem>>, vector<1x32xf32>
    %cst_69 = arith.constant dense<0.000000e+00> : vector<64x32xf32>
    %140 = tpu.matmul %133, %134, %cst_69 {dimension_numbers = #tpu.dot_dimension_numbers<[1], [0], [0], [1], [0, 0, 1, 1], [], []>} : vector<64x32xf32>, vector<32x32xf32>, vector<64x32xf32> -> vector<64x32xf32>
    %141 = vector.broadcast %135 : vector<1x32xf32> to vector<64x32xf32>
    %142 = arith.addf %140, %141 : vector<64x32xf32>
    %cst_70 = arith.constant dense<0.000000e+00> : vector<64x1xf32>
    %143 = tpu.matmul %142, %136, %cst_70 {dimension_numbers = #tpu.dot_dimension_numbers<[1], [0], [0], [1], [0, 0, 1, 1], [], []>} : vector<64x32xf32>, vector<32x1xf32>, vector<64x1xf32> -> vector<64x1xf32>
    %cst_71 = arith.constant dense<0.000000e+00> : vector<1x64xf32>
    %144 = tpu.matmul %137, %142, %cst_71 {dimension_numbers = #tpu.dot_dimension_numbers<[1], [1], [0], [0], [0, 0, 1, 0], [], []>} : vector<1x32xf32>, vector<64x32xf32>, vector<1x64xf32> -> vector<1x64xf32>
    %145 = vector.broadcast %143 : vector<64x1xf32> to vector<64x64xf32>
    %146 = vector.broadcast %144 : vector<1x64xf32> to vector<64x64xf32>
    %147 = arith.addf %145, %146 : vector<64x64xf32>
    %cst_72 = arith.constant 2.000000e-01 : f32
    %148 = vector.broadcast %cst_72 : f32 to vector<64x64xf32>
    %149 = arith.mulf %148, %147 : vector<64x64xf32>
    %150 = arith.maximumf %147, %149 : vector<64x64xf32>
    %151 = arith.addf %150, %0 : vector<64x64xf32>
    %cst_73 = arith.constant dense<0xFF800000> : vector<64xf32>
    %152 = vector.multi_reduction <maximumf>, %151, %cst_73 [1] : vector<64x64xf32> to vector<64xf32>
    %153 = vector.shape_cast %152 : vector<64xf32> to vector<64x1xf32>
    %154 = vector.broadcast %153 : vector<64x1xf32> to vector<64x64xf32>
    %155 = arith.subf %151, %154 : vector<64x64xf32>
    %156 = math.exp %155 : vector<64x64xf32>
    %cst_74 = arith.constant dense<0.000000e+00> : vector<64xf32>
    %157 = vector.multi_reduction <add>, %156, %cst_74 [1] : vector<64x64xf32> to vector<64xf32>
    %158 = vector.shape_cast %157 : vector<64xf32> to vector<64x1xf32>
    %159 = tpu.reciprocal %158 {approx = true} : vector<64x1xf32> -> vector<64x1xf32>
    %160 = vector.broadcast %159 : vector<64x1xf32> to vector<64x64xf32>
    %161 = arith.mulf %156, %160 : vector<64x64xf32>
    %cst_75 = arith.constant dense<0.000000e+00> : vector<64x32xf32>
    %162 = tpu.matmul %161, %142, %cst_75 {dimension_numbers = #tpu.dot_dimension_numbers<[1], [0], [0], [1], [0, 0, 1, 1], [], []>} : vector<64x64xf32>, vector<64x32xf32>, vector<64x32xf32> -> vector<64x32xf32>
    %163 = vector.broadcast %1 : vector<64x1xf32> to vector<64x32xf32>
    %164 = arith.mulf %162, %163 : vector<64x32xf32>
    %165 = vector.broadcast %138 : vector<1x32xf32> to vector<64x32xf32>
    %166 = arith.mulf %164, %165 : vector<64x32xf32>
    %167 = vector.broadcast %139 : vector<1x32xf32> to vector<64x32xf32>
    %168 = arith.addf %166, %167 : vector<64x32xf32>
    %cst_76 = arith.constant 0.000000e+00 : f32
    %169 = vector.broadcast %cst_76 : f32 to vector<64x32xf32>
    %170 = arith.maximumf %168, %169 : vector<64x32xf32>
    %171 = arith.addf %170, %133 : vector<64x32xf32>
    %c0_77 = arith.constant 0 : index
    %c0_78 = arith.constant 0 : index
    %172 = vector.load %arg5[%c0_77, %c0_78] : memref<2x64xf32, #tpu.memory_space<vmem>>, vector<2x64xf32>
    %cst_79 = arith.constant dense<0.000000e+00> : vector<2x32xf32>
    %173 = tpu.matmul %172, %171, %cst_79 {dimension_numbers = #tpu.dot_dimension_numbers<[1], [0], [0], [1], [0, 0, 1, 1], [], []>} : vector<2x64xf32>, vector<64x32xf32>, vector<2x32xf32> -> vector<2x32xf32>
    %c0_80 = arith.constant 0 : index
    %c0_81 = arith.constant 0 : index
    %174 = vector.load %arg6[%c0_80, %c0_81] : memref<32x32xf32, #tpu.memory_space<vmem>>, vector<32x32xf32>
    %cst_82 = arith.constant dense<0.000000e+00> : vector<2x32xf32>
    %175 = tpu.matmul %173, %174, %cst_82 {dimension_numbers = #tpu.dot_dimension_numbers<[1], [0], [0], [1], [0, 0, 1, 1], [], []>} : vector<2x32xf32>, vector<32x32xf32>, vector<2x32xf32> -> vector<2x32xf32>
    %c0_83 = arith.constant 0 : index
    %c0_84 = arith.constant 0 : index
    %176 = vector.load %arg7[%c0_83, %c0_84] : memref<1x32xf32, #tpu.memory_space<vmem>>, vector<1x32xf32>
    %177 = vector.broadcast %176 : vector<1x32xf32> to vector<2x32xf32>
    %178 = arith.addf %175, %177 : vector<2x32xf32>
    %cst_85 = arith.constant 0.000000e+00 : f32
    %179 = vector.broadcast %cst_85 : f32 to vector<2x32xf32>
    %180 = arith.maximumf %178, %179 : vector<2x32xf32>
    %c0_86 = arith.constant 0 : index
    %c0_87 = arith.constant 0 : index
    %181 = vector.load %arg8[%c0_86, %c0_87] : memref<32x10xf32, #tpu.memory_space<vmem>>, vector<32x10xf32>
    %cst_88 = arith.constant dense<0.000000e+00> : vector<2x10xf32>
    %182 = tpu.matmul %180, %181, %cst_88 {dimension_numbers = #tpu.dot_dimension_numbers<[1], [0], [0], [1], [0, 0, 1, 1], [], []>} : vector<2x32xf32>, vector<32x10xf32>, vector<2x10xf32> -> vector<2x10xf32>
    %c0_89 = arith.constant 0 : index
    %c0_90 = arith.constant 0 : index
    %183 = vector.load %arg9[%c0_89, %c0_90] : memref<1x10xf32, #tpu.memory_space<vmem>>, vector<1x10xf32>
    %184 = vector.broadcast %183 : vector<1x10xf32> to vector<2x10xf32>
    %185 = arith.addf %182, %184 : vector<2x10xf32>
    %c0_91 = arith.constant 0 : index
    %c0_92 = arith.constant 0 : index
    %186 = vector.load %arg28[%c0_91, %c0_92] : memref<2x10xf32, #tpu.memory_space<vmem>>, vector<2x10xf32>
    tpu.vector_store %arg28[%c0_91, %c0_92], %185 {strides = array<i32>} : memref<2x10xf32, #tpu.memory_space<vmem>>, vector<2x10xf32>,
    return
  }
}

</mosaic_0001>

<bundles_post_ra>
// kernel: tpu_custom_call.1
= control target key start
LH: loop header
LB: loop body
LE: loop exit
PB: predicated region body
PF: predicated region fallthrough
CT: control target
= control target key end

     0   :  { %s5831_s0 = inlined_call_operand.vmem [shape: f32[64,3], index: 0, kind: input, shape index: {}]   ;;  %s5832_s1 = inlined_call_operand.vmem [shape: f32[3,32], index: 1, kind: input, shape index: {}]   ;;  %s5833_s2 = inlined_call_operand.vmem [shape: f32[1,32], index: 2, kind: input, shape index: {}]   ;;  %s5834_s3 = inlined_call_operand.vmem [shape: f32[64,64], index: 3, kind: input, shape index: {}]   ;;  %s5835_s4 = inlined_call_operand.vmem [shape: f32[64,1], index: 4, kind: input, shape index: {}]   ;;  %s5836_s5 = inlined_call_operand.vmem [shape: f32[2,64], index: 5, kind: input, shape index: {}]   ;;  %s5837_s6 = inlined_call_operand.vmem [shape: f32[32,32], index: 6, kind: input, shape index: {}]   ;;  %s5838_s7 = inlined_call_operand.vmem [shape: f32[1,32], index: 7, kind: input, shape index: {}]   ;;  %s5839_s8 = inlined_call_operand.vmem [shape: f32[32,10], index: 8, kind: input, shape index: {}]   ;;  %s5840_s9 = inlined_call_operand.vmem [shape: f32[1,10], index: 9, kind: input, shape index: {}]   ;;  %s5841_s10 = inlined_call_operand.vmem [shape: f32[32,32], index: 10, kind: input, shape index: {}]   ;;  %s5842_s11 = inlined_call_operand.vmem [shape: f32[1,32], index: 11, kind: input, shape index: {}]   ;;  %s5843_s12 = inlined_call_operand.vmem [shape: f32[32,2], index: 12, kind: input, shape index: {}]   ;;  %s5844_s13 = inlined_call_operand.vmem [shape: f32[2,32], index: 13, kind: input, shape index: {}]   ;;  %s5845_s14 = inlined_call_operand.vmem [shape: f32[1,32], index: 14, kind: input, shape index: {}]   ;;  %s5846_s15 = inlined_call_operand.vmem [shape: f32[1,32], index: 15, kind: input, shape index: {}]   ;;  %s5847_s16 = inlined_call_operand.vmem [shape: f32[32,32], index: 16, kind: input, shape index: {}]   ;;  %s5848_s17 = inlined_call_operand.vmem [shape: f32[1,32], index: 17, kind: input, shape index: {}]   ;;  %s5849_s18 = inlined_call_operand.vmem [shape: f32[32,2], index: 18, kind: input, shape index: {}]   ;;  %s5850_s19 = inlined_call_operand.vmem [shape: f32[2,32], index: 19, kind: input, shape index: {}]   ;;  %s5851_s20 = inlined_call_operand.vmem [shape: f32[1,32], index: 20, kind: input, shape index: {}]   ;;  %s5852_s21 = inlined_call_operand.vmem [shape: f32[1,32], index: 21, kind: input, shape index: {}]   ;;  %s5853_s22 = inlined_call_operand.vmem [shape: f32[32,32], index: 22, kind: input, shape index: {}]   ;;  %s5854_s23 = inlined_call_operand.vmem [shape: f32[1,32], index: 23, kind: input, shape index: {}]   ;;  %s5855_s24 = inlined_call_operand.vmem [shape: f32[32,1], index: 24, kind: input, shape index: {}]   ;;  %s5856_s25 = inlined_call_operand.vmem [shape: f32[1,32], index: 25, kind: input, shape index: {}]   ;;  %s5857_s26 = inlined_call_operand.vmem [shape: f32[1,32], index: 26, kind: input, shape index: {}]   ;;  %s5858_s27 = inlined_call_operand.vmem [shape: f32[1,32], index: 27, kind: input, shape index: {}]   ;;  %s5859_s28 = inlined_call_operand.hbm [shape: f32[2,10], index: 28, kind: output, shape index: {}]  }
   0x1   :  { %5872 = sst [smem:[#allocation5_spill]] %s5831_s0 }
   0x2   :  { %5873 = sst [smem:[#allocation6_spill]] %s5832_s1 }
   0x3   :  { %5874 = sst [smem:[#allocation7_spill]] %s5833_s2 }
   0x4   :  { %5875 = sst [smem:[#allocation8_spill]] %s5834_s3 }
   0x5   :  { %5876 = sst [smem:[#allocation9_spill]] %s5835_s4 }
   0x6   :  { %5877 = sst [smem:[#allocation10_spill]] %s5836_s5 }
   0x7   :  { %5878 = sst [smem:[#allocation11_spill]] %s5837_s6 }
   0x8   :  { %5879 = sst [smem:[#allocation12_spill]] %s5838_s7 }
   0x9   :  { %5880 = sst [smem:[#allocation13_spill]] %s5839_s8 }
   0xa   :  { %5881 = sst [smem:[#allocation14_spill]] %s5840_s9 }
   0xb   :  { %5882 = sst [smem:[#allocation15_spill]] %s5841_s10 }
   0xc   :  { %5883 = sst [smem:[#allocation16_spill]] %s5842_s11 }
   0xd   :  { %5884 = sst [smem:[#allocation17_spill]] %s5843_s12 }
   0xe   :  { %s5885_s9 = sld [smem:[#allocation6_spill]]  ;;  %vm147_vm0 = vcmask 1042432   ;;  %s5886_s6 = sld [smem:[#allocation5_spill]]  ;;  %vm122_vm1 = vcmask 23552  }
   0xf   :  { %s5887_s12 = sld [smem:[#allocation15_spill]] }
  0x14   :  { %v114_v0 = vld [vmem:[%s5885_s9] sm:$0x7]  ;;  %v107_v2 = vld [vmem:[%s5886_s6 + $0x8] sm:$0xff]  ;;  %v108_v3 = vld [vmem:[%s5886_s6 + $0x10] sm:$0xff] }
  0x15   :  { %v106_v1 = vld [vmem:[%s5886_s6] sm:$0xff]  ;;  %3684 = vmatprep.subr.msk.mxu0 %vm147_vm0, %v114_v0  ;;  %v257_v5 = vld [vmem:[%s5887_s12 + $0x8] sm:$0xff] }
  0x16   :  { %3686 = vmatprep.mubr.msk.f32.mxu0 %vm122_vm1, %v106_v1  ;;  %3685 = vmatpush3.msk.msra.mxu0 %vm147_vm0, %v114_v0  ;;  %v256_v4 = vld [vmem:[%s5887_s12] sm:$0xff] }
  0x17   :  { %3687 = vmatmul.mubr.msk.f32.vlgmr.msra.gmra.mrb[0].mxu0 %vm122_vm1, %v107_v2 }
  0x18   :  { %33 = vsyncpa [#allocation3], 0  ;;  %3689 = vmatprep.mubr.msk.f32.mxu0 %vm122_vm1, %v108_v3  ;;  %v109_v6 = vld [vmem:[%s5886_s6 + $0x18] sm:$0xff]  ;;  %v4056_v7 = vpack.c.bf16 %v257_v5, %v256_v4  ;;  %v110_v8 = vld [vmem:[%s5886_s6 + $0x20] sm:$0xff]  ;;  %s5888_s30 = sld [smem:[#allocation17_spill]]  ;;  %s5889_s7 = sld [smem:[#allocation7_spill]] }
  0x19   :  { %v111_v9 = vld [vmem:[%s5886_s6 + $0x28] sm:$0xff]  ;;  %v112_v10 = vld [vmem:[%s5886_s6 + $0x30] sm:$0xff]  ;;  %v113_v11 = vld [vmem:[%s5886_s6 + $0x38] sm:$0xff]  ;;  %vm274_vm2 = vcmask 261120   ;;  %v5870_v38 = vmov 0.0|0.0   ;;  %vm4511_vm3 = vmmov 0  }
  0x1a   :  { %4057 = vmatprep.subr.bf16.mxu1 %v4056_v7  ;;  %v258_v12 = vld [vmem:[%s5887_s12 + $0x10] sm:$0xff]  ;;  %v259_v13 = vld [vmem:[%s5887_s12 + $0x18] sm:$0xff]  ;;  %v5868_v39 = vmov 0.0   ;;  %s5890_s8 = sld [smem:[#allocation16_spill]]  ;;  %vm4769_vm4 = vmpackc.low %vm274_vm2, %vm274_vm2  ;;  %v4513_v3 = vmov 1   ;;  %v4514_v4 = vmov 0  }
  0x1b   :  { %3690 = vmatmul.mubr.msk.f32.gmra.mrb[2].mxu0 %vm122_vm1, %v109_v6  ;;  %4059 = vmatpush3.bf16.msra.mxu1 %v4056_v7  ;;  %v4060_v14 = vpack.c.bf16 %v259_v13, %v258_v12  ;;  %v265_v2 = vld [vmem:[%s5844_s13] sm:$0x3]  ;;  %s5893_s3 = sld [smem:[#allocation8_spill]]  ;;  %vm682_vm5 = vcmask 523264   ;;  %s5894_s0 = sld [smem:[#allocation9_spill]]  ;;  %vm1241_vm6 = vcmask 130048  }
  0x1c   :  { %3692 = vmatprep.mubr.msk.f32.mxu0 %vm122_vm1, %v110_v8  ;;  %4264 = vset.pattern.permute.xlu0 %v4513_v3  ;;  %s4516_s5 = smov 16   ;;  %s5903_s10 = sld [smem:[#allocation10_spill]]  ;;  %vm3322_vm7 = vcmask 74752  }
  0x1d   :  { %4061 = vmatprep.subr.bf16.mxu1 %v4060_v14  ;;  %4265 = vset.pattern.permute.xlu1 %v4514_v4  ;;  %s5904_s29 = sld [smem:[#allocation13_spill]] }
  0x1e   :  { %v261_v15 = vld [vmem:[%s5888_s30] sm:$0xff]  ;;  %v262_v16 = vld [vmem:[%s5888_s30 + $0x8] sm:$0xff]  ;;  %v263_v17 = vld [vmem:[%s5888_s30 + $0x10] sm:$0xff] }
  0x1f   :  { %3693 = vmatmul.mubr.msk.f32.gmra.mrb[4].mxu0 %vm122_vm1, %v111_v9  ;;  %4063 = vmatpush3.bf16.msra.mxu1 %v4060_v14  ;;  %v4064_v18 = vpack.c.bf16 %v262_v16, %v261_v15  ;;  %v264_v19 = vld [vmem:[%s5888_s30 + $0x18] sm:$0xff]  ;;  %v3338_v21 = vld [vmem:[%s5889_s7] ss:$0 sm:$0xff]  ;;  %v646_v15 = vlaneseq  ;;  %s4515_s30 = smov 112  }
  0x20   :  { %3695 = vmatprep.mubr.msk.f32.mxu0 %vm122_vm1, %v112_v10  ;;  %v4068_v20 = vpack.c.bf16 %v264_v19, %v263_v17  ;;  %4072 = vmatprep.subr.bf16.mxu1 %v5870_v38  ;;  %v3348_v40 = vld [vmem:[%s5890_s8] ss:$0 sm:$0xff] }
  0x21   :  { %4065 = vmatprep.subr.bf16.mxu0 %v4064_v18  ;;  %v4839_v16 = vshrl.u32 %v646_v15, 7 }
  0x22   :  { %4067 = vmatpush3.bf16.msra.mxu0 %v4064_v18 }
  0x23   :  { %3696 = vmatmul.mubr.msk.f32.gmra.mrb[6].mxu0 %vm122_vm1, %v113_v11  ;;  %4069 = vmatprep.subr.bf16.mxu0 %v4068_v20  ;;  %v4842_v18 = vsub.s32 0, %v4839_v16 }
  0x26   :  { %4071 = vmatpush3.bf16.msra.mxu0 %v4068_v20  ;;  %v5867_v20 = vsub.s32 1, %v4839_v16 }
  0xea   :  { %v3688_v22 = vpop.f32.mrb[0].mxu0 }
  0xeb   :  { %v217_v23 = vpop.f32.mrb[1].mxu0  ;;  %v4727_v25 = vadd.f32 %v3688_v22, %v3338_v21 }
  0xec   :  { %v4725_v24 = vadd.f32 %v3338_v21, %v217_v23 }
  0xee   :  { %v3691_v26 = vpop.f32.mrb[2].mxu0  ;;  %3706 = vmatprep.mubr.msk.f32.mxu1 %vm274_vm2, %v4725_v24 }
  0xef   :  { %v4731_v27 = vadd.f32 %v3691_v26, %v3338_v21  ;;  %v227_v28 = vpop.f32.mrb[3].mxu0  ;;  %3707 = vmatmul.mubr.msk.f32.vlgmr.msra.gmra.mrb[0].mxu1 %vm274_vm2, %v4727_v25 }
  0xf0   :  { %v4735_v29 = vadd.f32 %v3338_v21, %v227_v28 }
  0xf2   :  { %v3694_v30 = vpop.f32.mrb[4].mxu0  ;;  %3709 = vmatprep.mubr.msk.f32.mxu1 %vm274_vm2, %v4735_v29 }
  0xf3   :  { %v4739_v31 = vadd.f32 %v3694_v30, %v3338_v21  ;;  %v237_v32 = vpop.f32.mrb[5].mxu0  ;;  %3710 = vmatmul.mubr.msk.f32.gmra.mrb[2].mxu1 %vm274_vm2, %v4731_v27 }
  0xf4   :  { %v4743_v33 = vadd.f32 %v3338_v21, %v237_v32 }
  0xf6   :  { %3712 = vmatprep.mubr.msk.f32.mxu1 %vm274_vm2, %v4743_v33  ;;  %v3697_v34 = vpop.f32.mrb[6].mxu0 }
  0xf7   :  { %3713 = vmatmul.mubr.msk.f32.gmra.mrb[4].mxu1 %vm274_vm2, %v4739_v31  ;;  %v4749_v35 = vadd.f32 %v3697_v34, %v3338_v21  ;;  %v247_v36 = vpop.f32.mrb[7].mxu0 }
  0xf8   :  { %v4751_v37 = vadd.f32 %v3338_v21, %v247_v36 }
  0xfa   :  { %3715 = vmatprep.mubr.msk.f32.mxu1 %vm274_vm2, %v4751_v37 }
  0xfb   :  { %3716 = vmatmul.mubr.msk.f32.gmra.mrb[6].mxu1 %vm274_vm2, %v4749_v35 }
  0xfc   :  { %3754 = vmatprep.mubr.msk.f32.mxu1 %vm4511_vm3, %v5868_v39 }
 0x1c2   :  { %v3708_v41 = vpop.f32.mrb[0].mxu1 }
 0x1c3   :  { %v4763_v42 = vadd.f32 %v3708_v41, %v3348_v40  ;;  %v365_v43 = vpop.f32.mrb[1].mxu1 }
 0x1c4   :  { %v4765_v44 = vadd.f32 %v3348_v40, %v365_v43 }
 0x1c6   :  { %v4073_v46 = vpack.c.bf16 %v4763_v42, %v4765_v44  ;;  %v3711_v47 = vpop.f32.mrb[2].mxu1  ;;  %3726 = vmatprep.mubr.msk.f32.mxu0 %vm274_vm2, %v4765_v44  ;;  %v4269_v48 = vpack.i.bf16 %v4763_v42, %v4765_v44 }
 0x1c7   :  { %v4779_v49 = vadd.f32 %v3711_v47, %v3348_v40  ;;  %v375_v50 = vpop.f32.mrb[3].mxu1  ;;  %3727 = vmatmul.mubr.msk.f32.vlgmr.msra.gmra.mrb[8].mxu0 %vm274_vm2, %v4763_v42 }
 0x1c8   :  { %v4783_v51 = vadd.f32 %v3348_v40, %v375_v50  ;;  %4075 = vmatpush3.bf16.xpose.msk.msra.mxu1 %vm4769_vm4, %v4073_v46  ;;  %4089 = vmatprep.subr.bf16.mxu0 %v4073_v46 }
 0x1c9   :  { %4091 = vmatpush3.bf16.msra.mxu0 %v4073_v46  ;;  %4076 = vmatprep.subr.bf16.mxu1 %v5870_v38 }
 0x1ca   :  { %v3714_v52 = vpop.f32.mrb[4].mxu1  ;;  %3729 = vmatprep.mubr.msk.f32.mxu0 %vm274_vm2, %v4783_v51  ;;  %v4077_v53 = vpack.c.bf16 %v4779_v49, %v4783_v51  ;;  %v4274_v54 = vpack.i.bf16 %v4779_v49, %v4783_v51 }
 0x1cb   :  { %v4794_v55 = vadd.f32 %v3714_v52, %v3348_v40  ;;  %v385_v56 = vpop.f32.mrb[5].mxu1  ;;  %3730 = vmatmul.mubr.msk.f32.gmra.mrb[10].mxu0 %vm274_vm2, %v4779_v49 }
 0x1cc   :  { %v4798_v57 = vadd.f32 %v3348_v40, %v385_v56  ;;  %4093 = vmatprep.subr.bf16.mxu0 %v4077_v53 }
 0x1cd   :  { %4095 = vmatpush3.bf16.msra.mxu0 %v4077_v53 }
 0x1ce   :  { %3732 = vmatprep.mubr.msk.f32.mxu0 %vm274_vm2, %v4798_v57  ;;  %v4081_v58 = vpack.c.bf16 %v4794_v55, %v4798_v57  ;;  %v3717_v59 = vpop.f32.mrb[6].mxu1  ;;  %v4279_v60 = vpack.i.bf16 %v4794_v55, %v4798_v57 }
 0x1cf   :  { %3733 = vmatmul.mubr.msk.f32.gmra.mrb[12].mxu0 %vm274_vm2, %v4794_v55  ;;  %v4808_v61 = vadd.f32 %v3717_v59, %v3348_v40  ;;  %v395_v62 = vpop.f32.mrb[7].mxu1 }
 0x1d0   :  { %4079 = vmatpush3.bf16.xpose.msk.msra.mxu1 %vm4769_vm4, %v4077_v53  ;;  %4097 = vmatprep.subr.bf16.mxu0 %v4081_v58  ;;  %v4812_v63 = vadd.f32 %v3348_v40, %v395_v62 }
 0x1d1   :  { %4099 = vmatpush3.bf16.msra.mxu0 %v4081_v58  ;;  %4080 = vmatprep.subr.bf16.mxu1 %v5870_v38 }
 0x1d2   :  { %3735 = vmatprep.mubr.msk.f32.mxu0 %vm274_vm2, %v4812_v63  ;;  %v4085_v0 = vpack.c.bf16 %v4808_v61, %v4812_v63  ;;  %v4284_v1 = vpack.i.bf16 %v4808_v61, %v4812_v63 }
 0x1d3   :  { %3736 = vmatmul.mubr.msk.f32.gmra.mrb[14].mxu0 %vm274_vm2, %v4808_v61 }
 0x1d4   :  { %4101 = vmatprep.subr.bf16.mxu0 %v4085_v0 }
 0x1d5   :  { %4103 = vmatpush3.bf16.msra.mxu0 %v4085_v0 }
 0x1d8   :  { %4083 = vmatpush3.bf16.xpose.msk.msra.mxu1 %vm4769_vm4, %v4081_v58 }
 0x1d9   :  { %4084 = vmatprep.subr.bf16.mxu1 %v5870_v38 }
 0x1e0   :  { %4087 = vmatpush3.bf16.xpose.msk.msra.mxu1 %vm4769_vm4, %v4085_v0 }
 0x1e7   :  { %3755 = vmatmul.mubr.msk.f32.vlgmr.msra.gmra.mrb[8].mxu1 %vm274_vm2, %v265_v2  ;;  %v4862_v2 = vld [vmem:[%s5893_s3 + $0x18] sm:$0xff] }
 0x29a   :  { %v3728_v5 = vpop.f32.mrb[8].mxu0 }
 0x29b   :  { %v494_v6 = vpop.f32.mrb[9].mxu0 }
 0x29c   :  { %901 = vperm.xlu0 %4264, %v494_v6  }
 0x29e   :  { %v3731_v7 = vpop.f32.mrb[10].mxu0 }
 0x29f   :  { %623 = vperm.xlu1 %4265, %v3731_v7   ;;  %v504_v8 = vpop.f32.mrb[11].mxu0 }
 0x2a0   :  { %913 = vperm.xlu0 %4264, %v3731_v7  }
 0x2a2   :  { %v3734_v9 = vpop.f32.mrb[12].mxu0 }
 0x2a3   :  { %618 = vperm.xlu1 %4265, %v504_v8   ;;  %v514_v10 = vpop.f32.mrb[13].mxu0 }
 0x2a4   :  { %921 = vperm.xlu0 %4264, %v3734_v9  }
 0x2a6   :  { %v3737_v11 = vpop.f32.mrb[14].mxu0 }
 0x2a7   :  { %633 = vperm.xlu1 %4265, %v3734_v9   ;;  %v524_v12 = vpop.f32.mrb[15].mxu0 }
 0x2a8   :  { %4267 = vset.pattern.permute.xlu0 %v4514_v4 }
 0x2a9   :  { %608 = vperm.xlu0 %4267, %v494_v6  }
 0x2ab   :  { %643 = vperm.xlu1 %4265, %v3737_v11  }
 0x2ad   :  { %613 = vperm.xlu0 %4267, %v3728_v5  }
 0x2af   :  { %4266 = vset.pattern.permute.xlu1 %v4513_v3 }
 0x2b0   :  { %905 = vperm.xlu1 %4266, %v3728_v5   ;;  %v90_v5 = vld [vmem:[%s5893_s3] sm:$0xff] }
 0x2b1   :  { %628 = vperm.xlu0 %4267, %v514_v10  }
 0x2b4   :  { %909 = vperm.xlu1 %4266, %v504_v8  }
 0x2b5   :  { %638 = vperm.xlu0 %4267, %v524_v12  }
 0x2b8   :  { %917 = vperm.xlu1 %4266, %v514_v10  }
 0x2b9   :  { %4268 = vset.pattern.permute.xlu0 %v4513_v3 }
 0x2ba   :  { %929 = vperm.xlu0 %4268, %v3737_v11   ;;  %v602_v13 = vpop.f32.mrb[8].mxu1 }
 0x2bb   :  { %v3756_v14 = vpop.f32.mrb[9].mxu1  ;;  %v4846_v22 = vrot.slane %v602_v13, %v4842_v18  ;;  %v4850_v26 = vrot.slane %v602_v13, %v5867_v20 }
 0x2bc   :  { %925 = vperm.xlu1 %4266, %v524_v12   ;;  %v91_v14 = vld [vmem:[%s5893_s3 + $0x8] sm:$0xff] }
 0x2be   :  { %4290 = vset.pattern.permute.xlu0 %v4514_v4 }
 0x2c0   :  { %4289 = vset.pattern.permute.xlu1 %v4514_v4 }
 0x31b   :  { %v902_v17 = vpop.permute.xlu0 %901 }
 0x31c   :  { %v936_v34 = vadd.f32 %v4850_v26, %v902_v17 }
 0x31e   :  { %v624_v19 = vpop.permute.xlu1 %623  ;;  %v944_v47 = vmul.f32 0.2, %v936_v34 }
 0x31f   :  { %v914_v21 = vpop.permute.xlu0 %913  ;;  %v653_v30 = vadd.f32 %v4846_v22, %v624_v19 }
 0x320   :  { %v952_v6 = vmax.f32 %v936_v34, %v944_v47 }
 0x321   :  { %v661_v36 = vmul.f32 0.2, %v653_v30 }
 0x322   :  { %v619_v23 = vpop.permute.xlu1 %618 }
 0x323   :  { %v922_v28 = vpop.permute.xlu0 %921  ;;  %v669_v52 = vmax.f32 %v653_v30, %v661_v36  ;;  %v652_v53 = vadd.f32 %v4846_v22, %v619_v23 }
 0x325   :  { %v660_v10 = vmul.f32 0.2, %v652_v53  ;;  %v4874_v15 = vadd.f32 %v669_v52, %v4862_v2  ;;  %v95_v52 = vld [vmem:[%s5893_s3 + $0x28] sm:$0xff] }
 0x326   :  { %v634_v32 = vpop.permute.xlu1 %633 }
 0x327   :  { %v655_v40 = vadd.f32 %v4846_v22, %v634_v32  ;;  %v939_v32 = vadd.f32 %v4850_v26, %v914_v21 }
 0x328   :  { %v609_v41 = vpop.permute.xlu0 %608 }
 0x329   :  { %v650_v43 = vadd.f32 %v4846_v22, %v609_v41  ;;  %v663_v56 = vmul.f32 0.2, %v655_v40  ;;  %v668_v41 = vmax.f32 %v652_v53, %v660_v10  ;;  %v92_v53 = vld [vmem:[%s5893_s3 + $0x10] sm:$0xff] }
 0x32a   :  { %v644_v46 = vpop.permute.xlu1 %643 }
 0x32b   :  { %v658_v50 = vmul.f32 0.2, %v650_v43  ;;  %v657_v62 = vadd.f32 %v4846_v22, %v644_v46  ;;  %v671_v11 = vmax.f32 %v655_v40, %v663_v56  ;;  %v4882_v40 = vadd.f32 %v952_v6, %v90_v5 }
 0x32c   :  { %v614_v58 = vpop.permute.xlu0 %613 }
 0x32d   :  { %v666_v59 = vmax.f32 %v650_v43, %v658_v50  ;;  %v651_v0 = vadd.f32 %v4846_v22, %v614_v58  ;;  %v665_v17 = vmul.f32 0.2, %v657_v62  ;;  %v692_v50 = vsel %vm682_vm5, %v4874_v15, -inf }
 0x32e   :  { %v968_v10 = vsel %vm682_vm5, %v4882_v40, -inf }
 0x32f   :  { %v659_v7 = vmul.f32 0.2, %v651_v0  ;;  %v906_v8 = vpop.permute.xlu1 %905  ;;  %v4867_v9 = vadd.f32 %v666_v59, %v90_v5  ;;  %v673_v56 = vmax.f32 %v657_v62, %v665_v17  ;;  %v4892_v59 = vadd.f32 %v671_v11, %v95_v52 }
 0x330   :  { %v937_v12 = vadd.f32 %v4850_v26, %v906_v8  ;;  %v629_v13 = vpop.permute.xlu0 %628  ;;  %v947_v5 = vmul.f32 0.2, %v939_v32  ;;  %v941_v62 = vadd.f32 %v4850_v26, %v922_v28  ;;  %v4903_v11 = vadd.f32 %v668_v41, %v92_v53  ;;  %v94_v28 = vld [vmem:[%s5893_s3 + $0x20] sm:$0xff] }
 0x331   :  { %v667_v19 = vmax.f32 %v651_v0, %v659_v7  ;;  %v654_v23 = vadd.f32 %v4846_v22, %v629_v13  ;;  %v683_v30 = vsel %vm682_vm5, %v4867_v9, -inf  ;;  %v97_v0 = vld [vmem:[%s5893_s3 + $0x38] sm:$0xff] }
 0x332   :  { %684 = vmax.xlane.f32.xlu1 %v683_v30  ;;  %v945_v43 = vmul.f32 0.2, %v937_v12  ;;  %v4908_v30 = vadd.f32 %v673_v56, %v97_v0 }
 0x333   :  { %v910_v34 = vpop.permute.xlu1 %909  ;;  %v4880_v36 = vadd.f32 %v667_v19, %v91_v14  ;;  %v662_v46 = vmul.f32 0.2, %v654_v23  ;;  %v698_v19 = vsel %vm682_vm5, %v4892_v59, -inf }
 0x334   :  { %v639_v47 = vpop.permute.xlu0 %638  ;;  %v938_v58 = vadd.f32 %v4850_v26, %v910_v34  ;;  %v953_v7 = vmax.f32 %v937_v12, %v945_v43  ;;  %v955_v12 = vmax.f32 %v939_v32, %v947_v5  ;;  %v689_v43 = vsel %vm682_vm5, %v4903_v11, -inf }
 0x335   :  { %v686_v21 = vsel %vm682_vm5, %v4880_v36, -inf  ;;  %v670_v8 = vmax.f32 %v654_v23, %v662_v46  ;;  %v949_v23 = vmul.f32 0.2, %v941_v62  ;;  %v656_v41 = vadd.f32 %v4846_v22, %v639_v47 }
 0x336   :  { %687 = vmax.xlane.f32.xlu0 %v686_v21  ;;  %693 = vmax.xlane.f32.xlu1 %v692_v50  ;;  %v946_v13 = vmul.f32 0.2, %v938_v58  ;;  %v4918_v50 = vadd.f32 %v953_v7, %v91_v14  ;;  %v704_v20 = vsel %vm682_vm5, %v4908_v30, -inf  ;;  %v4924_v32 = vadd.f32 %v955_v12, %v4862_v2 }
 0x337   :  { %v918_v6 = vpop.permute.xlu1 %917  ;;  %v4916_v46 = vadd.f32 %v670_v8, %v94_v28  ;;  %v957_v22 = vmax.f32 %v941_v62, %v949_v23  ;;  %v664_v47 = vmul.f32 0.2, %v656_v41 }
 0x338   :  { %v940_v17 = vadd.f32 %v4850_v26, %v918_v6  ;;  %v954_v56 = vmax.f32 %v938_v58, %v946_v13  ;;  %v971_v14 = vsel %vm682_vm5, %v4918_v50, -inf  ;;  %v977_v2 = vsel %vm682_vm5, %v4924_v32, -inf }
 0x339   :  { %v930_v34 = vpop.permute.xlu0 %929  ;;  %v695_v5 = vsel %vm682_vm5, %v4916_v46, -inf  ;;  %v4935_v62 = vadd.f32 %v957_v22, %v95_v52 }
 0x33a   :  { %969 = vmax.xlane.f32.xlu0 %v968_v10  ;;  %699 = vmax.xlane.f32.xlu1 %v698_v19  ;;  %v948_v21 = vmul.f32 0.2, %v940_v17  ;;  %v943_v6 = vadd.f32 %v4850_v26, %v930_v34  ;;  %v4931_v13 = vadd.f32 %v954_v56, %v92_v53 }
 0x33b   :  { %v926_v10 = vpop.permute.xlu1 %925  ;;  %v983_v53 = vsel %vm682_vm5, %v4935_v62, -inf }
 0x33c   :  { %v956_v58 = vmax.f32 %v940_v17, %v948_v21  ;;  %v951_v7 = vmul.f32 0.2, %v943_v6  ;;  %v942_v8 = vadd.f32 %v4850_v26, %v926_v10  ;;  %v974_v12 = vsel %vm682_vm5, %v4931_v13, -inf  ;;  %v96_v26 = vld [vmem:[%s5893_s3 + $0x30] sm:$0xff] }
 0x33e   :  { %690 = vmax.xlane.f32.xlu0 %v689_v43  ;;  %705 = vmax.xlane.f32.xlu1 %v704_v20  ;;  %v672_v20 = vmax.f32 %v656_v41, %v664_v47  ;;  %v959_v19 = vmax.f32 %v943_v6, %v951_v7  ;;  %v950_v34 = vmul.f32 0.2, %v942_v8  ;;  %v4939_v23 = vadd.f32 %v956_v58, %v94_v28 }
 0x340   :  { %v958_v17 = vmax.f32 %v942_v8, %v950_v34  ;;  %v980_v52 = vsel %vm682_vm5, %v4939_v23, -inf  ;;  %v4948_v41 = vadd.f32 %v672_v20, %v96_v26  ;;  %v4950_v43 = vadd.f32 %v959_v19, %v97_v0 }
 0x342   :  { %696 = vmax.xlane.f32.xlu0 %v695_v5  ;;  %972 = vmax.xlane.f32.xlu1 %v971_v14  ;;  %v701_v28 = vsel %vm682_vm5, %v4948_v41, -inf  ;;  %v989_v56 = vsel %vm682_vm5, %v4950_v43, -inf  ;;  %v4956_v21 = vadd.f32 %v958_v17, %v96_v26 }
 0x344   :  { %v986_v6 = vsel %vm682_vm5, %v4956_v21, -inf }
 0x346   :  { %975 = vmax.xlane.f32.xlu0 %v974_v12  ;;  %978 = vmax.xlane.f32.xlu1 %v977_v2 }
 0x34a   :  { %981 = vmax.xlane.f32.xlu0 %v980_v52  ;;  %984 = vmax.xlane.f32.xlu1 %v983_v53 }
 0x34e   :  { %702 = vmax.xlane.f32.xlu0 %v701_v28  ;;  %990 = vmax.xlane.f32.xlu1 %v989_v56 }
 0x352   :  { %987 = vmax.xlane.f32.xlu0 %v986_v6 }
 0x368   :  { %4270 = vrot.lane.b32.xlu0 %v4269_v48, %s4515_s30 }
 0x3bf   :  { %v685_v0 = vpop.xlane.xlu1 %684 }
 0x3c0   :  { %v707_v10 = vsub.f32 %v4867_v9, %v685_v0 }
 0x3c2   :  { %v715_v22 = vmul.f32 1.442695, %v707_v10 }
 0x3c3   :  { %v688_v47 = vpop.xlane.xlu0 %687  ;;  %v694_v5 = vpop.xlane.xlu1 %693 }
 0x3c4   :  { %4317 = vpow2.f32 %v715_v22  ;;  %v708_v14 = vsub.f32 %v4880_v36, %v688_v47  ;;  %v710_v9 = vsub.f32 %v4874_v15, %v694_v5 }
 0x3c6   :  { %v717_v58 = vmul.f32 1.442695, %v708_v14 }
 0x3c7   :  { %v970_v7 = vpop.xlane.xlu0 %969  ;;  %v700_v8 = vpop.xlane.xlu1 %699 }
 0x3c8   :  { %4319 = vpow2.f32 %v717_v58  ;;  %v992_v20 = vsub.f32 %v4882_v40, %v970_v7 }
 0x3ca   :  { %v1000_v2 = vmul.f32 1.442695, %v992_v20 }
 0x3cb   :  { %v691_v19 = vpop.xlane.xlu0 %690  ;;  %v706_v34 = vpop.xlane.xlu1 %705 }
 0x3cc   :  { %4321 = vpow2.f32 %v1000_v2  ;;  %v709_v42 = vsub.f32 %v4903_v11, %v691_v19  ;;  %v721_v11 = vmul.f32 1.442695, %v710_v9 }
 0x3ce   :  { %v4968_v44 = vpop.eup %4317  ;;  %v719_v48 = vmul.f32 1.442695, %v709_v42 }
 0x3cf   :  { %v697_v12 = vpop.xlane.xlu0 %696  ;;  %v973_v26 = vpop.xlane.xlu1 %972  ;;  %v731_v36 = vsel %vm682_vm5, %v4968_v44, 0.0 }
 0x3d0   :  { %4323 = vpow2.f32 %v719_v48  ;;  %v993_v53 = vsub.f32 %v4918_v50, %v973_v26  ;;  %732 = vadd.xlane.f32.xlu0 %v731_v36  ;;  %v711_v17 = vsub.f32 %v4916_v46, %v697_v12  ;;  %v712_v46 = vsub.f32 %v4892_v59, %v700_v8 }
 0x3d1   :  { %v714_v48 = vsub.f32 %v4908_v30, %v706_v34 }
 0x3d2   :  { %v4974_v40 = vpop.eup %4319  ;;  %v1002_v52 = vmul.f32 1.442695, %v993_v53  ;;  %v723_v50 = vmul.f32 1.442695, %v711_v17  ;;  %v725_v20 = vmul.f32 1.442695, %v712_v46 }
 0x3d3   :  { %v976_v28 = vpop.xlane.xlu0 %975  ;;  %v979_v56 = vpop.xlane.xlu1 %978  ;;  %v734_v15 = vsel %vm682_vm5, %v4974_v40, 0.0 }
 0x3d4   :  { %v994_v6 = vsub.f32 %v4931_v13, %v976_v28  ;;  %v995_v0 = vsub.f32 %v4924_v32, %v979_v56  ;;  %735 = vadd.xlane.f32.xlu1 %v734_v15  ;;  %4325 = vpow2.f32 %v1002_v52 }
 0x3d5   :  { %4327 = vpow2.f32 %v721_v11 }
 0x3d6   :  { %v4981_v10 = vpop.eup %4321  ;;  %v1004_v22 = vmul.f32 1.442695, %v994_v6  ;;  %v1006_v47 = vmul.f32 1.442695, %v995_v0 }
 0x3d7   :  { %v982_v5 = vpop.xlane.xlu0 %981  ;;  %v1016_v14 = vsel %vm682_vm5, %v4981_v10, 0.0  ;;  %v985_v13 = vpop.xlane.xlu1 %984 }
 0x3d8   :  { %4329 = vpow2.f32 %v1004_v22  ;;  %v996_v58 = vsub.f32 %v4939_v23, %v982_v5  ;;  %1017 = vadd.xlane.f32.xlu0 %v1016_v14  ;;  %v997_v2 = vsub.f32 %v4935_v62, %v985_v13 }
 0x3d9   :  { %4331 = vpow2.f32 %v723_v50 }
 0x3da   :  { %v4987_v32 = vpop.eup %4323  ;;  %v1008_v7 = vmul.f32 1.442695, %v996_v58  ;;  %4333 = vpow2.f32 %v1006_v47  ;;  %v1010_v9 = vmul.f32 1.442695, %v997_v2 }
 0x3db   :  { %v703_v19 = vpop.xlane.xlu0 %702  ;;  %v737_v59 = vsel %vm682_vm5, %v4987_v32, 0.0  ;;  %v991_v26 = vpop.xlane.xlu1 %990 }
 0x3dc   :  { %v713_v8 = vsub.f32 %v4948_v41, %v703_v19  ;;  %738 = vadd.xlane.f32.xlu0 %v737_v59  ;;  %4335 = vpow2.f32 %v1008_v7  ;;  %v729_v41 = vmul.f32 1.442695, %v714_v48  ;;  %v999_v17 = vsub.f32 %v4950_v43, %v991_v26 }
 0x3dd   :  { %4337 = vpow2.f32 %v725_v20 }
 0x3de   :  { %v727_v42 = vmul.f32 1.442695, %v713_v8  ;;  %v4993_v23 = vpop.eup %4325  ;;  %v1014_v0 = vmul.f32 1.442695, %v999_v17 }
 0x3df   :  { %v988_v12 = vpop.xlane.xlu0 %987  ;;  %v1019_v62 = vsel %vm682_vm5, %v4993_v23, 0.0  ;;  %v4998_v36 = vpop.eup %4327 }
 0x3e0   :  { %1020 = vadd.xlane.f32.xlu1 %v1019_v62  ;;  %4339 = vpow2.f32 %v727_v42  ;;  %v740_v56 = vsel %vm682_vm5, %v4998_v36, 0.0  ;;  %v998_v43 = vsub.f32 %v4956_v21, %v988_v12 }
 0x3e1   :  { %4341 = vpow2.f32 %v1010_v9 }
 0x3e2   :  { %v5000_v53 = vpop.eup %4329  ;;  %4343 = vpow2.f32 %v729_v41  ;;  %v1012_v5 = vmul.f32 1.442695, %v998_v43 }
 0x3e3   :  { %v4271_v52 = vpop.permute.xlu0 %4270  ;;  %v1022_v30 = vsel %vm682_vm5, %v5000_v53, 0.0  ;;  %v5005_v34 = vpop.eup %4331  ;;  %4345 = vpow2.f32 %v1014_v0 }
 0x3e4   :  { %v4273_v11 = vunpack.i.h.bf16 %v4271_v52  ;;  %v4272_v28 = vunpack.i.l.bf16 %v4271_v52  ;;  %1023 = vadd.xlane.f32.xlu0 %v1022_v30  ;;  %v5009_v15 = vpop.eup %4333  ;;  %741 = vadd.xlane.f32.xlu1 %v740_v56  ;;  %v743_v50 = vsel %vm682_vm5, %v5005_v34, 0.0  ;;  %4347 = vpow2.f32 %v1012_v5 }
 0x3e5   :  { %v1025_v46 = vsel %vm682_vm5, %v5009_v15, 0.0 }
 0x3e6   :  { %v4104_v6 = vpack.c.bf16 %v4273_v11, %v4272_v28  ;;  %v5014_v22 = vpop.eup %4335 }
 0x3e7   :  { %v5018_v47 = vpop.eup %4337  ;;  %v1028_v14 = vsel %vm682_vm5, %v5014_v22, 0.0 }
 0x3e8   :  { %4105 = vmatprep.subr.bf16.mxu0 %v4104_v6  ;;  %744 = vadd.xlane.f32.xlu0 %v743_v50  ;;  %v746_v21 = vsel %vm682_vm5, %v5018_v47, 0.0 }
 0x3e9   :  { %1026 = vadd.xlane.f32.xlu1 %v1025_v46 }
 0x3ea   :  { %v5022_v58 = vpop.eup %4339 }
 0x3eb   :  { %v5026_v13 = vpop.eup %4341  ;;  %v749_v7 = vsel %vm682_vm5, %v5022_v58, 0.0 }
 0x3ec   :  { %1029 = vadd.xlane.f32.xlu0 %v1028_v14  ;;  %v1031_v20 = vsel %vm682_vm5, %v5026_v13, 0.0  ;;  %v5032_v2 = vpop.eup %4343 }
 0x3ed   :  { %747 = vadd.xlane.f32.xlu1 %v746_v21  ;;  %v752_v19 = vsel %vm682_vm5, %v5032_v2, 0.0  ;;  %v5036_v59 = vpop.eup %4345 }
 0x3ee   :  { %v1037_v8 = vsel %vm682_vm5, %v5036_v59, 0.0  ;;  %v5040_v42 = vpop.eup %4347 }
 0x3ef   :  { %v1034_v48 = vsel %vm682_vm5, %v5040_v42, 0.0 }
 0x3f0   :  { %750 = vadd.xlane.f32.xlu0 %v749_v7 }
 0x3f1   :  { %1032 = vadd.xlane.f32.xlu1 %v1031_v20 }
 0x3f5   :  { %753 = vadd.xlane.f32.xlu1 %v752_v19 }
 0x3f9   :  { %1038 = vadd.xlane.f32.xlu1 %v1037_v8 }
 0x3fd   :  { %1035 = vadd.xlane.f32.xlu1 %v1034_v48 }
 0x406   :  { %4280 = vrot.lane.b32.xlu0 %v4279_v60, %s4515_s30 }
 0x40a   :  { %4285 = vrot.lane.b32.xlu0 %v4284_v1, %s4515_s30 }
 0x40e   :  { %4275 = vrot.lane.b32.xlu1 %v4274_v54, %s4515_s30 }
 0x45d   :  { %v733_v9 = vpop.xlane.xlu0 %732 }
 0x45e   :  { %4349 = vrcp.f32 %v733_v9 }
 0x461   :  { %v736_v12 = vpop.xlane.xlu1 %735 }
 0x462   :  { %4351 = vrcp.f32 %v736_v12 }
 0x465   :  { %v1018_v26 = vpop.xlane.xlu0 %1017 }
 0x468   :  { %v4350_v62 = vpop.eup %4349 }
 0x469   :  { %v739_v41 = vpop.xlane.xlu0 %738  ;;  %v763_v55 = vmul.f32 %v4350_v62, %v4968_v44 }
 0x46a   :  { %4353 = vrcp.f32 %v739_v41 }
 0x46b   :  { %3773 = vmatprep.mubr.msk.f32.mxu0 %vm682_vm5, %v763_v55 }
 0x46c   :  { %v4352_v57 = vpop.eup %4351 }
 0x46d   :  { %v764_v60 = vmul.f32 %v4352_v57, %v4974_v40  ;;  %v1021_v61 = vpop.xlane.xlu1 %1020 }
 0x46f   :  { %3774 = vmatmul.mubr.msk.f32.vlgmr.msra.gmra.mrb[16].mxu0 %vm682_vm5, %v764_v60 }
 0x470   :  { %4107 = vmatpush3.bf16.msra.mxu0 %v4104_v6 }
 0x471   :  { %v1024_v49 = vpop.xlane.xlu0 %1023  ;;  %v742_v51 = vpop.xlane.xlu1 %741 }
 0x472   :  { %4355 = vrcp.f32 %v742_v51 }
 0x474   :  { %v4354_v54 = vpop.eup %4353 }
 0x475   :  { %v745_v63 = vpop.xlane.xlu0 %744  ;;  %v765_v1 = vmul.f32 %v4354_v54, %v4987_v32 }
 0x476   :  { %4357 = vrcp.f32 %v745_v63  ;;  %v1027_v17 = vpop.xlane.xlu1 %1026 }
 0x477   :  { %3776 = vmatprep.mubr.msk.f32.mxu0 %vm682_vm5, %v765_v1 }
 0x479   :  { %v1030_v44 = vpop.xlane.xlu0 %1029 }
 0x47a   :  { %v748_v52 = vpop.xlane.xlu1 %747 }
 0x47b   :  { %4359 = vrcp.f32 %v748_v52  ;;  %v105_v52 = vld [vmem:[%s5894_s0 + $0x38] sm:$0xff] }
 0x47c   :  { %v4356_v30 = vpop.eup %4355 }
 0x47d   :  { %v751_v40 = vpop.xlane.xlu0 %750  ;;  %v766_v28 = vmul.f32 %v4356_v30, %v4998_v36  ;;  %v102_v30 = vld [vmem:[%s5894_s0 + $0x20] sm:$0xff] }
 0x47e   :  { %4361 = vrcp.f32 %v751_v40  ;;  %v1033_v11 = vpop.xlane.xlu1 %1032  ;;  %v104_v40 = vld [vmem:[%s5894_s0 + $0x30] sm:$0xff] }
 0x47f   :  { %3777 = vmatmul.mubr.msk.f32.gmra.mrb[18].mxu0 %vm682_vm5, %v766_v28  ;;  %4363 = vrcp.f32 %v1018_v26 }
 0x480   :  { %v4358_v56 = vpop.eup %4357 }
 0x481   :  { %v767_v6 = vmul.f32 %v4358_v56, %v5005_v34  ;;  %v4281_v36 = vpop.permute.xlu0 %4280 }
 0x482   :  { %v754_v32 = vpop.xlane.xlu1 %753  ;;  %v4283_v8 = vunpack.i.h.bf16 %v4281_v36  ;;  %v4282_v48 = vunpack.i.l.bf16 %v4281_v36 }
 0x483   :  { %4365 = vrcp.f32 %v754_v32  ;;  %3779 = vmatprep.mubr.msk.f32.mxu0 %vm682_vm5, %v767_v6 }
 0x484   :  { %4367 = vrcp.f32 %v1021_v61  ;;  %v4112_v41 = vpack.c.bf16 %v4283_v8, %v4282_v48 }
 0x485   :  { %v4360_v0 = vpop.eup %4359  ;;  %v4286_v12 = vpop.permute.xlu0 %4285  ;;  %4369 = vrcp.f32 %v1024_v49 }
 0x486   :  { %v1039_v43 = vpop.xlane.xlu1 %1038  ;;  %v768_v50 = vmul.f32 %v4360_v0, %v5018_v47  ;;  %v4288_v26 = vunpack.i.h.bf16 %v4286_v12  ;;  %v4287_v62 = vunpack.i.l.bf16 %v4286_v12  ;;  %4371 = vrcp.f32 %v1027_v17 }
 0x487   :  { %4373 = vrcp.f32 %v1030_v44 }
 0x488   :  { %v4362_v46 = vpop.eup %4361  ;;  %3780 = vmatmul.mubr.msk.f32.gmra.mrb[20].mxu0 %vm682_vm5, %v768_v50  ;;  %4375 = vrcp.f32 %v1033_v11 }
 0x489   :  { %v769_v5 = vmul.f32 %v4362_v46, %v5022_v58  ;;  %v4364_v21 = vpop.eup %4363  ;;  %v1342_v46 = vld [vmem:[%s5847_s16] sm:$0xff] }
 0x48a   :  { %v1036_v14 = vpop.xlane.xlu1 %1035  ;;  %v1048_v19 = vmul.f32 %v4364_v21, %v4981_v10  ;;  %v4116_v10 = vpack.c.bf16 %v4288_v26, %v4287_v62  ;;  %v1345_v21 = vld [vmem:[%s5847_s16 + $0x18] sm:$0xff]  ;;  %v1348_v26 = vld [vmem:[%s5849_s18 + $0x8] sm:$0xff] }
 0x48b   :  { %3782 = vmatprep.mubr.msk.f32.mxu0 %vm682_vm5, %v769_v5  ;;  %4377 = vrcp.f32 %v1036_v14  ;;  %v1343_v5 = vld [vmem:[%s5847_s16 + $0x8] sm:$0xff]  ;;  %v1344_v14 = vld [vmem:[%s5847_s16 + $0x10] sm:$0xff] }
 0x48c   :  { %4379 = vrcp.f32 %v1039_v43  ;;  %v4120_v36 = vpack.c.bf16 %v1343_v5, %v1342_v46 }
 0x48d   :  { %v4366_v7 = vpop.eup %4365 }
 0x48e   :  { %v4276_v34 = vpop.permute.xlu1 %4275  ;;  %v770_v20 = vmul.f32 %v4366_v7, %v5032_v2  ;;  %v4368_v2 = vpop.eup %4367  ;;  %4121 = vmatprep.subr.bf16.mxu1 %v4120_v36  ;;  %v4124_v7 = vpack.c.bf16 %v1345_v21, %v1344_v14 }
 0x48f   :  { %v4278_v9 = vunpack.i.h.bf16 %v4276_v34  ;;  %v4277_v47 = vunpack.i.l.bf16 %v4276_v34  ;;  %v4370_v55 = vpop.eup %4369  ;;  %v1049_v57 = vmul.f32 %v4368_v2, %v4993_v23  ;;  %4123 = vmatpush3.bf16.msra.mxu1 %v4120_v36 }
 0x490   :  { %3783 = vmatmul.mubr.msk.f32.gmra.mrb[22].mxu0 %vm682_vm5, %v770_v20  ;;  %v4372_v60 = vpop.eup %4371  ;;  %v1050_v61 = vmul.f32 %v4370_v55, %v5000_v53  ;;  %4125 = vmatprep.subr.bf16.mxu1 %v4124_v7 }
 0x491   :  { %3801 = vmatprep.mubr.msk.f32.mxu0 %vm682_vm5, %v1048_v19  ;;  %v4108_v58 = vpack.c.bf16 %v4278_v9, %v4277_v47  ;;  %v4374_v49 = vpop.eup %4373  ;;  %v1051_v51 = vmul.f32 %v4372_v60, %v5009_v15  ;;  %v98_v15 = vld [vmem:[%s5894_s0] sm:$0xff] }
 0x492   :  { %v4376_v54 = vpop.eup %4375  ;;  %v1052_v63 = vmul.f32 %v4374_v49, %v5014_v22  ;;  %1252 = vperm.xlu1 %4289, %v98_v15   ;;  %v100_v22 = vld [vmem:[%s5894_s0 + $0x10] sm:$0xff] }
 0x493   :  { %4109 = vmatprep.subr.bf16.mxu0 %v4108_v58  ;;  %v1053_v23 = vmul.f32 %v4376_v54, %v5026_v13  ;;  %v99_v13 = vld [vmem:[%s5894_s0 + $0x8] sm:$0xff]  ;;  %4127 = vmatpush3.bf16.msra.mxu1 %v4124_v7  ;;  %v3390_v54 = vld [vmem:[%s5845_s14] ss:$0 sm:$0xff] }
 0x494   :  { %4111 = vmatpush3.bf16.msra.mxu0 %v4108_v58  ;;  %1257 = vperm.xlu0 %4290, %v99_v13   ;;  %v1347_v58 = vld [vmem:[%s5849_s18] sm:$0xff] }
 0x495   :  { %4113 = vmatprep.subr.bf16.mxu0 %v4112_v41  ;;  %v4378_v1 = vpop.eup %4377  ;;  %v4128_v62 = vpack.c.bf16 %v1348_v26, %v1347_v58 }
 0x496   :  { %v4380_v17 = vpop.eup %4379  ;;  %v1054_v53 = vmul.f32 %v4378_v1, %v5040_v42  ;;  %1262 = vperm.xlu1 %4289, %v100_v22   ;;  %v103_v42 = vld [vmem:[%s5894_s0 + $0x28] sm:$0xff] }
 0x497   :  { %v1055_v44 = vmul.f32 %v4380_v17, %v5036_v59  ;;  %v101_v59 = vld [vmem:[%s5894_s0 + $0x18] sm:$0xff]  ;;  %4129 = vmatprep.subr.bf16.mxu1 %v4128_v62  ;;  %s5905_s0 = sld [smem:[#allocation12_spill]] }
 0x498   :  { %4115 = vmatpush3.bf16.msra.mxu0 %v4112_v41  ;;  %1272 = vperm.xlu0 %4290, %v102_v30  }
 0x499   :  { %4117 = vmatprep.subr.bf16.mxu0 %v4116_v10 }
 0x49a   :  { %1267 = vperm.xlu1 %4289, %v101_v59  }
 0x49c   :  { %4119 = vmatpush3.bf16.msra.mxu0 %v4116_v10  ;;  %1282 = vperm.xlu0 %4290, %v104_v40  }
 0x49d   :  { %4136 = vmatprep.subr.bf16.mxu0 %v5870_v38 }
 0x49e   :  { %1277 = vperm.xlu1 %4289, %v103_v42  }
 0x49f   :  { %3802 = vmatmul.mubr.msk.f32.vlgmr.msra.gmra.mrb[24].mxu0 %vm682_vm5, %v1049_v57 }
 0x4a0   :  { %3804 = vmatprep.mubr.msk.f32.mxu0 %vm682_vm5, %v1050_v61  ;;  %4291 = vset.pattern.permute.xlu0 %v4513_v3 }
 0x4a2   :  { %1287 = vperm.xlu1 %4289, %v105_v52  }
 0x4a3   :  { %3805 = vmatmul.mubr.msk.f32.gmra.mrb[26].mxu0 %vm682_vm5, %v1051_v51 }
 0x4a4   :  { %3807 = vmatprep.mubr.msk.f32.mxu0 %vm682_vm5, %v1052_v63 }
 0x4a7   :  { %3808 = vmatmul.mubr.msk.f32.gmra.mrb[28].mxu0 %vm682_vm5, %v1053_v23 }
 0x4a8   :  { %3810 = vmatprep.mubr.msk.f32.mxu0 %vm682_vm5, %v1054_v53  ;;  %v3391_v53 = vld [vmem:[%s5846_s15] ss:$0 sm:$0xff] }
 0x4ab   :  { %3811 = vmatmul.mubr.msk.f32.gmra.mrb[30].mxu0 %vm682_vm5, %v1055_v44 }
 0x4ac   :  { %3869 = vmatprep.mubr.msk.f32.mxu0 %vm4511_vm3, %v5868_v39 }
 0x511   :  { %v5150_v41 = vpop.permute.xlu1 %1252 }
 0x513   :  { %v5156_v55 = vpop.permute.xlu0 %1257 }
 0x515   :  { %v5152_v10 = vpop.permute.xlu1 %1262 }
 0x517   :  { %v5160_v60 = vpop.permute.xlu0 %1272 }
 0x519   :  { %v5154_v2 = vpop.permute.xlu1 %1267 }
 0x51b   :  { %v5164_v49 = vpop.permute.xlu0 %1282 }
 0x51d   :  { %v5158_v57 = vpop.permute.xlu1 %1277 }
 0x521   :  { %v5162_v61 = vpop.permute.xlu1 %1287 }
 0x542   :  { %v3775_v11 = vpop.f32.mrb[16].mxu0 }
 0x543   :  { %v861_v28 = vpop.f32.mrb[17].mxu0 }
 0x552   :  { %v3778_v56 = vpop.f32.mrb[18].mxu0 }
 0x553   :  { %v871_v6 = vpop.f32.mrb[19].mxu0 }
 0x55b   :  { %v5116_v32 = vpop.f32.mrb[20].mxu0 }
 0x55c   :  { %v5118_v0 = vpop.f32.mrb[21].mxu0 }
 0x563   :  { %v5120_v43 = vpop.f32.mrb[22].mxu0 }
 0x564   :  { %v5122_v50 = vpop.f32.mrb[23].mxu0 }
 0x572   :  { %v3803_v34 = vpop.f32.mrb[24].mxu0 }
 0x573   :  { %1219 = vrot.lane.b32.xlu1 %v3803_v34, %s4516_s5  ;;  %v1170_v20 = vpop.f32.mrb[25].mxu0 }
 0x574   :  { %1217 = vrot.lane.b32.xlu0 %v1170_v20, %s4516_s5 }
 0x576   :  { %v3806_v19 = vpop.f32.mrb[26].mxu0 }
 0x577   :  { %1223 = vrot.lane.b32.xlu1 %v3806_v19, %s4516_s5  ;;  %v1180_v8 = vpop.f32.mrb[27].mxu0 }
 0x578   :  { %1221 = vrot.lane.b32.xlu0 %v1180_v8, %s4516_s5 }
 0x57a   :  { %v3809_v48 = vpop.f32.mrb[28].mxu0 }
 0x57b   :  { %1227 = vrot.lane.b32.xlu1 %v3809_v48, %s4516_s5  ;;  %v1190_v9 = vpop.f32.mrb[29].mxu0 }
 0x57c   :  { %1225 = vrot.lane.b32.xlu0 %v1190_v9, %s4516_s5 }
 0x57e   :  { %v3812_v47 = vpop.f32.mrb[30].mxu0 }
 0x57f   :  { %1231 = vrot.lane.b32.xlu1 %v3812_v47, %s4516_s5  ;;  %v1200_v12 = vpop.f32.mrb[31].mxu0 }
 0x580   :  { %1229 = vrot.lane.b32.xlu0 %v1200_v12, %s4516_s5 }
 0x5e5   :  { %v1220_v51 = vpop.permute.xlu1 %1219 }
 0x5e6   :  { %v1243_v63 = vsel %vm1241_vm6, %v3775_v11, %v1220_v51  ;;  %v1218_v1 = vpop.permute.xlu0 %1217 }
 0x5e7   :  { %v1291_v23 = vmul.f32 %v5156_v55, %v1243_v63  ;;  %v1242_v17 = vsel %vm1241_vm6, %v861_v28, %v1218_v1 }
 0x5e8   :  { %v1290_v44 = vmul.f32 %v5150_v41, %v1242_v17 }
 0x5e9   :  { %v1305_v15 = vmul.f32 %v3390_v54, %v1291_v23  ;;  %v1224_v22 = vpop.permute.xlu1 %1223 }
 0x5ea   :  { %v1304_v13 = vmul.f32 %v3390_v54, %v1290_v44  ;;  %v1245_v59 = vsel %vm1241_vm6, %v3778_v56, %v1224_v22  ;;  %v1222_v42 = vpop.permute.xlu0 %1221  ;;  %v1349_v56 = vld [vmem:[%s5849_s18 + $0x10] sm:$0xff] }
 0x5eb   :  { %v1319_v52 = vadd.f32 %v3391_v53, %v1305_v15  ;;  %v1293_v30 = vmul.f32 %v5154_v2, %v1245_v59  ;;  %v1244_v40 = vsel %vm1241_vm6, %v871_v6, %v1222_v42  ;;  %v1350_v6 = vld [vmem:[%s5849_s18 + $0x18] sm:$0xff]  ;;  %s4517_s18 = smov [#allocation2]  }
 0x5ec   :  { %v1318_v11 = vadd.f32 %v3391_v53, %v1304_v13  ;;  %v1292_v28 = vmul.f32 %v5152_v10, %v1244_v40  ;;  %v4132_v51 = vpack.c.bf16 %v1350_v6, %v1349_v56 }
 0x5ed   :  { %v1327_v46 = vmax.f32 %v1319_v52, 0.0  ;;  %v1307_v5 = vmul.f32 %v3390_v54, %v1293_v30  ;;  %v1228_v36 = vpop.permute.xlu1 %1227 }
 0x5ee   :  { %v1326_v14 = vmax.f32 %v1318_v11, 0.0  ;;  %v1306_v21 = vmul.f32 %v3390_v54, %v1292_v28  ;;  %v1247_v7 = vsel %vm1241_vm6, %v5116_v32, %v1228_v36  ;;  %v1226_v34 = vpop.permute.xlu0 %1225 }
 0x5ef   :  { %v1321_v20 = vadd.f32 %v3391_v53, %v1307_v5  ;;  %v1295_v19 = vmul.f32 %v5158_v57, %v1247_v7  ;;  %v1246_v8 = vsel %vm1241_vm6, %v5118_v0, %v1226_v34  ;;  %v5196_v47 = vadd.f32 %v1327_v46, %v4727_v25 }
 0x5f0   :  { %v1320_v48 = vadd.f32 %v3391_v53, %v1306_v21  ;;  %v1294_v9 = vmul.f32 %v5160_v60, %v1246_v8  ;;  %v5193_v32 = vadd.f32 %v1326_v14, %v4725_v24 }
 0x5f1   :  { %v1329_v12 = vmax.f32 %v1321_v20, 0.0  ;;  %v1309_v58 = vmul.f32 %v3390_v54, %v1295_v19  ;;  %v1232_v26 = vpop.permute.xlu1 %1231 }
 0x5f2   :  { %v1328_v63 = vmax.f32 %v1320_v48, 0.0  ;;  %v1308_v1 = vmul.f32 %v3390_v54, %v1294_v9  ;;  %v1249_v23 = vsel %vm1241_vm6, %v5120_v43, %v1232_v26  ;;  %3821 = vmatprep.mubr.msk.f32.mxu1 %vm274_vm2, %v5193_v32  ;;  %v1230_v0 = vpop.permute.xlu0 %1229 }
 0x5f3   :  { %v1323_v17 = vadd.f32 %v3391_v53, %v1309_v58  ;;  %v1297_v24 = vmul.f32 %v5162_v61, %v1249_v23  ;;  %v1248_v25 = vsel %vm1241_vm6, %v5122_v50, %v1230_v0  ;;  %3822 = vmatmul.mubr.msk.f32.vlgmr.msra.gmra.mrb[10].mxu1 %vm274_vm2, %v5196_v47  ;;  %v5212_v59 = vadd.f32 %v1329_v12, %v4731_v27 }
 0x5f4   :  { %v1322_v44 = vadd.f32 %v3391_v53, %v1308_v1  ;;  %v1296_v15 = vmul.f32 %v5164_v49, %v1248_v25  ;;  %v5209_v22 = vadd.f32 %v1328_v63, %v4735_v29  ;;  %4131 = vmatpush3.bf16.msra.mxu1 %v4128_v62  ;;  %v1351_v1 = vld [vmem:[%s5850_s19] sm:$0x3] }
 0x5f5   :  { %v1331_v43 = vmax.f32 %v1323_v17, 0.0  ;;  %v1311_v13 = vmul.f32 %v3390_v54, %v1297_v24  ;;  %4133 = vmatprep.subr.bf16.mxu1 %v4132_v51 }
 0x5f6   :  { %v1330_v42 = vmax.f32 %v1322_v44, 0.0  ;;  %v1310_v52 = vmul.f32 %v3390_v54, %v1296_v15  ;;  %3824 = vmatprep.mubr.msk.f32.mxu1 %vm274_vm2, %v5209_v22 }
 0x5f7   :  { %v1325_v50 = vadd.f32 %v3391_v53, %v1311_v13  ;;  %3825 = vmatmul.mubr.msk.f32.gmra.mrb[12].mxu1 %vm274_vm2, %v5212_v59  ;;  %v5222_v40 = vadd.f32 %v1331_v43, %v4739_v31  ;;  %v3392_v31 = vld [vmem:[%s5848_s17] ss:$0 sm:$0xff] }
 0x5f8   :  { %v1324_v30 = vadd.f32 %v3391_v53, %v1310_v52  ;;  %v5219_v29 = vadd.f32 %v1330_v42, %v4743_v33  ;;  %4135 = vmatpush3.bf16.msra.mxu1 %v4132_v51 }
 0x5f9   :  { %v1333_v62 = vmax.f32 %v1325_v50, 0.0  ;;  %v5895_v50 = vsub.s32 1, %v4839_v16 }
 0x5fa   :  { %v1332_v27 = vmax.f32 %v1324_v30, 0.0  ;;  %3827 = vmatprep.mubr.msk.f32.mxu1 %vm274_vm2, %v5219_v29 }
 0x5fb   :  { %3828 = vmatmul.mubr.msk.f32.gmra.mrb[14].mxu1 %vm274_vm2, %v5222_v40  ;;  %v5232_v53 = vadd.f32 %v1333_v62, %v4749_v35 }
 0x5fc   :  { %v5229_v54 = vadd.f32 %v1332_v27, %v4751_v37 }
 0x5fe   :  { %3830 = vmatprep.mubr.msk.f32.mxu1 %vm274_vm2, %v5229_v54 }
 0x5ff   :  { %3831 = vmatmul.mubr.msk.f32.gmra.mrb[16].mxu1 %vm274_vm2, %v5232_v53 }
 0x6c6   :  { %v3823_v33 = vpop.f32.mrb[10].mxu1 }
 0x6c7   :  { %v5241_v11 = vadd.f32 %v3823_v33, %v3392_v31  ;;  %v1450_v28 = vpop.f32.mrb[11].mxu1 }
 0x6c8   :  { %v5243_v46 = vadd.f32 %v3392_v31, %v1450_v28 }
 0x6ca   :  { %v4137_v37 = vpack.c.bf16 %v5241_v11, %v5243_v46  ;;  %v3826_v5 = vpop.f32.mrb[12].mxu1  ;;  %3841 = vmatprep.mubr.msk.f32.mxu1 %vm274_vm2, %v5243_v46 }
 0x6cb   :  { %v5251_v36 = vadd.f32 %v3826_v5, %v3392_v31  ;;  %v1460_v14 = vpop.f32.mrb[13].mxu1  ;;  %3842 = vmatmul.mubr.msk.f32.vlgmr.msra.gmra.mrb[18].mxu1 %vm274_vm2, %v5241_v11 }
 0x6cc   :  { %v5255_v21 = vadd.f32 %v3392_v31, %v1460_v14  ;;  %4139 = vmatpush3.bf16.xpose.msk.msra.mxu0 %vm4769_vm4, %v4137_v37  ;;  %4153 = vmatprep.subr.bf16.mxu1 %v4137_v37 }
 0x6cd   :  { %4155 = vmatpush3.bf16.msra.mxu1 %v4137_v37  ;;  %4140 = vmatprep.subr.bf16.mxu0 %v5870_v38 }
 0x6ce   :  { %v3829_v34 = vpop.f32.mrb[14].mxu1  ;;  %3844 = vmatprep.mubr.msk.f32.mxu1 %vm274_vm2, %v5255_v21  ;;  %v4141_v56 = vpack.c.bf16 %v5251_v36, %v5255_v21 }
 0x6cf   :  { %v5266_v6 = vadd.f32 %v3829_v34, %v3392_v31  ;;  %v1470_v20 = vpop.f32.mrb[15].mxu1  ;;  %3845 = vmatmul.mubr.msk.f32.gmra.mrb[20].mxu1 %vm274_vm2, %v5251_v36 }
 0x6d0   :  { %v5270_v19 = vadd.f32 %v3392_v31, %v1470_v20  ;;  %4157 = vmatprep.subr.bf16.mxu1 %v4141_v56 }
 0x6d1   :  { %4159 = vmatpush3.bf16.msra.mxu1 %v4141_v56 }
 0x6d2   :  { %v3832_v48 = vpop.f32.mrb[16].mxu1  ;;  %3847 = vmatprep.mubr.msk.f32.mxu1 %vm274_vm2, %v5270_v19  ;;  %v4145_v9 = vpack.c.bf16 %v5266_v6, %v5270_v19 }
 0x6d3   :  { %v5278_v12 = vadd.f32 %v3832_v48, %v3392_v31  ;;  %v1480_v58 = vpop.f32.mrb[17].mxu1  ;;  %3848 = vmatmul.mubr.msk.f32.gmra.mrb[22].mxu1 %vm274_vm2, %v5266_v6 }
 0x6d4   :  { %v5282_v26 = vadd.f32 %v3392_v31, %v1480_v58  ;;  %4143 = vmatpush3.bf16.xpose.msk.msra.mxu0 %vm4769_vm4, %v4141_v56  ;;  %4161 = vmatprep.subr.bf16.mxu1 %v4145_v9 }
 0x6d5   :  { %4163 = vmatpush3.bf16.msra.mxu1 %v4145_v9  ;;  %4144 = vmatprep.subr.bf16.mxu0 %v5870_v38 }
 0x6d6   :  { %3850 = vmatprep.mubr.msk.f32.mxu1 %vm274_vm2, %v5282_v26  ;;  %v4149_v63 = vpack.c.bf16 %v5278_v12, %v5282_v26 }
 0x6d7   :  { %3851 = vmatmul.mubr.msk.f32.gmra.mrb[24].mxu1 %vm274_vm2, %v5278_v12 }
 0x6d8   :  { %4165 = vmatprep.subr.bf16.mxu1 %v4149_v63 }
 0x6d9   :  { %4167 = vmatpush3.bf16.msra.mxu1 %v4149_v63 }
 0x6dc   :  { %4147 = vmatpush3.bf16.xpose.msk.msra.mxu0 %vm4769_vm4, %v4145_v9  ;;  %v5331_v9 = vld [vmem:[%s5893_s3] sm:$0xff] }
 0x6dd   :  { %4148 = vmatprep.subr.bf16.mxu0 %v5870_v38 }
 0x6e4   :  { %4151 = vmatpush3.bf16.xpose.msk.msra.mxu0 %vm4769_vm4, %v4149_v63 }
 0x6eb   :  { %3870 = vmatmul.mubr.msk.f32.vlgmr.msra.gmra.mrb[32].mxu0 %vm274_vm2, %v1351_v1 }
 0x79e   :  { %v3843_v23 = vpop.f32.mrb[18].mxu1 }
 0x79f   :  { %1698 = vperm.xlu1 %4289, %v3843_v23   ;;  %v1579_v0 = vpop.f32.mrb[19].mxu1 }
 0x7a0   :  { %1985 = vperm.xlu0 %4291, %v1579_v0  }
 0x7a2   :  { %v3846_v17 = vpop.f32.mrb[20].mxu1 }
 0x7a3   :  { %1708 = vperm.xlu1 %4289, %v3846_v17   ;;  %v1589_v24 = vpop.f32.mrb[21].mxu1 }
 0x7a4   :  { %1997 = vperm.xlu0 %4291, %v3846_v17  }
 0x7a6   :  { %v3849_v25 = vpop.f32.mrb[22].mxu1 }
 0x7a7   :  { %1718 = vperm.xlu1 %4289, %v3849_v25   ;;  %v1599_v44 = vpop.f32.mrb[23].mxu1 }
 0x7a8   :  { %2005 = vperm.xlu0 %4291, %v3849_v25  }
 0x7aa   :  { %v3852_v15 = vpop.f32.mrb[24].mxu1 }
 0x7ab   :  { %1728 = vperm.xlu1 %4289, %v3852_v15   ;;  %v1609_v43 = vpop.f32.mrb[25].mxu1 }
 0x7ac   :  { %4293 = vset.pattern.permute.xlu0 %v4514_v4 }
 0x7ad   :  { %1693 = vperm.xlu0 %4293, %v1579_v0  }
 0x7af   :  { %4292 = vset.pattern.permute.xlu1 %v4513_v3 }
 0x7b0   :  { %1989 = vperm.xlu1 %4292, %v3843_v23  }
 0x7b1   :  { %1703 = vperm.xlu0 %4293, %v1589_v24  }
 0x7b4   :  { %1993 = vperm.xlu1 %4292, %v1589_v24  }
 0x7b5   :  { %1713 = vperm.xlu0 %4293, %v1599_v44  }
 0x7b8   :  { %2001 = vperm.xlu1 %4292, %v1599_v44  }
 0x7b9   :  { %1723 = vperm.xlu0 %4293, %v1609_v43  }
 0x7bc   :  { %2009 = vperm.xlu1 %4292, %v1609_v43  }
 0x7bd   :  { %4294 = vset.pattern.permute.xlu0 %v4513_v3 }
 0x7be   :  { %2013 = vperm.xlu0 %4294, %v3852_v15   ;;  %v1687_v13 = vpop.f32.mrb[32].mxu0 }
 0x7bf   :  { %v3871_v42 = vpop.f32.mrb[33].mxu0  ;;  %v5310_v52 = vrot.slane %v1687_v13, %v4842_v18  ;;  %v5314_v30 = vrot.slane %v1687_v13, %v5895_v50 }
 0x7c0   :  { %4316 = vset.pattern.permute.xlu1 %v4514_v4 }
 0x7c2   :  { %4315 = vset.pattern.permute.xlu0 %v4514_v4  ;;  %v5321_v4 = vld [vmem:[%s5893_s3 + $0x8] sm:$0xff] }
 0x81e   :  { %v1699_v62 = vpop.permute.xlu1 %1698 }
 0x81f   :  { %v1736_v27 = vadd.f32 %v5310_v52, %v1699_v62  ;;  %v1986_v31 = vpop.permute.xlu0 %1985 }
 0x820   :  { %v2020_v3 = vadd.f32 %v5314_v30, %v1986_v31 }
 0x821   :  { %v1744_v33 = vmul.f32 0.2, %v1736_v27 }
 0x822   :  { %v2028_v28 = vmul.f32 0.2, %v2020_v3  ;;  %v1709_v37 = vpop.permute.xlu1 %1708 }
 0x823   :  { %v1752_v5 = vmax.f32 %v1736_v27, %v1744_v33  ;;  %v1998_v14 = vpop.permute.xlu0 %1997  ;;  %v1738_v63 = vadd.f32 %v5310_v52, %v1709_v37 }
 0x824   :  { %v2036_v34 = vmax.f32 %v2020_v3, %v2028_v28 }
 0x825   :  { %v5324_v16 = vadd.f32 %v5321_v4, %v1752_v5  ;;  %v1746_v24 = vmul.f32 0.2, %v1738_v63 }
 0x826   :  { %v1719_v56 = vpop.permute.xlu1 %1718  ;;  %v5334_v58 = vadd.f32 %v5331_v9, %v2036_v34 }
 0x827   :  { %v2006_v20 = vpop.permute.xlu0 %2005  ;;  %v1770_v48 = vsel %vm682_vm5, %v5324_v16, -inf  ;;  %v1740_v23 = vadd.f32 %v5310_v52, %v1719_v56  ;;  %v1754_v50 = vmax.f32 %v1738_v63, %v1746_v24  ;;  %v2023_v24 = vadd.f32 %v5314_v30, %v1998_v14 }
 0x828   :  { %1771 = vmax.xlane.f32.xlu0 %v1770_v48  ;;  %v2052_v0 = vsel %vm682_vm5, %v5334_v58, -inf }
 0x829   :  { %v1748_v44 = vmul.f32 0.2, %v1740_v23 }
 0x82a   :  { %v1729_v1 = vpop.permute.xlu1 %1728 }
 0x82b   :  { %v1742_v13 = vadd.f32 %v5310_v52, %v1729_v1  ;;  %v1756_v31 = vmax.f32 %v1740_v23, %v1748_v44  ;;  %v5354_v23 = vld [vmem:[%s5893_s3 + $0x18] sm:$0xff] }
 0x82c   :  { %v1694_v17 = vpop.permute.xlu0 %1693  ;;  %2053 = vmax.xlane.f32.xlu0 %v2052_v0  ;;  %v5357_v0 = vadd.f32 %v5354_v23, %v1754_v50 }
 0x82d   :  { %v1735_v25 = vadd.f32 %v5310_v52, %v1694_v17  ;;  %v1750_v37 = vmul.f32 0.2, %v1742_v13 }
 0x82f   :  { %v1743_v15 = vmul.f32 0.2, %v1735_v25  ;;  %v1990_v43 = vpop.permute.xlu1 %1989 }
 0x830   :  { %v1704_v42 = vpop.permute.xlu0 %1703  ;;  %v2021_v5 = vadd.f32 %v5314_v30, %v1990_v43 }
 0x831   :  { %v1751_v62 = vmax.f32 %v1735_v25, %v1743_v15  ;;  %v1737_v27 = vadd.f32 %v5310_v52, %v1704_v42  ;;  %v5363_v15 = vld [vmem:[%s5893_s3 + $0x10] sm:$0xff]  ;;  %v5371_v42 = vld [vmem:[%s5893_s3 + $0x28] sm:$0xff] }
 0x832   :  { %v5374_v50 = vadd.f32 %v5371_v42, %v1756_v31  ;;  %v2029_v14 = vmul.f32 0.2, %v2021_v5  ;;  %v2031_v31 = vmul.f32 0.2, %v2023_v24 }
 0x833   :  { %v1745_v3 = vmul.f32 0.2, %v1737_v27  ;;  %v1994_v33 = vpop.permute.xlu1 %1993  ;;  %v5344_v28 = vadd.f32 %v5331_v9, %v1751_v62  ;;  %v1758_v62 = vmax.f32 %v1742_v13, %v1750_v37  ;;  %v2025_v13 = vadd.f32 %v5314_v30, %v2006_v20 }
 0x834   :  { %v2022_v34 = vadd.f32 %v5314_v30, %v1994_v33  ;;  %v1714_v56 = vpop.permute.xlu0 %1713 }
 0x835   :  { %v1753_v48 = vmax.f32 %v1737_v27, %v1745_v3  ;;  %v1739_v1 = vadd.f32 %v5310_v52, %v1714_v56  ;;  %v1767_v63 = vsel %vm682_vm5, %v5344_v28, -inf  ;;  %v2033_v7 = vmul.f32 0.2, %v2025_v13 }
 0x836   :  { %v2030_v17 = vmul.f32 0.2, %v2022_v34  ;;  %1768 = vmax.xlane.f32.xlu1 %v1767_v63 }
 0x837   :  { %v1747_v25 = vmul.f32 0.2, %v1739_v1  ;;  %v2002_v44 = vpop.permute.xlu1 %2001  ;;  %v5366_v43 = vadd.f32 %v5363_v15, %v1753_v48  ;;  %v1776_v48 = vsel %vm682_vm5, %v5357_v0, -inf }
 0x838   :  { %v2038_v27 = vmax.f32 %v2022_v34, %v2030_v17  ;;  %v2024_v3 = vadd.f32 %v5314_v30, %v2002_v44  ;;  %v1724_v33 = vpop.permute.xlu0 %1723  ;;  %v5386_v34 = vld [vmem:[%s5893_s3 + $0x20] sm:$0xff]  ;;  %v1782_v17 = vsel %vm682_vm5, %v5374_v50, -inf }
 0x839   :  { %v1755_v56 = vmax.f32 %v1739_v1, %v1747_v25  ;;  %v1741_v63 = vadd.f32 %v5310_v52, %v1724_v33  ;;  %v1773_v39 = vsel %vm682_vm5, %v5366_v43, -inf  ;;  %v2037_v1 = vmax.f32 %v2021_v5, %v2029_v14 }
 0x83a   :  { %v2032_v38 = vmul.f32 0.2, %v2024_v3  ;;  %1777 = vmax.xlane.f32.xlu1 %v1776_v48  ;;  %1774 = vmax.xlane.f32.xlu0 %v1773_v39  ;;  %v5396_v39 = vld [vmem:[%s5893_s3 + $0x38] sm:$0xff]  ;;  %v5402_v25 = vadd.f32 %v5363_v15, %v2038_v27  ;;  %v2039_v48 = vmax.f32 %v2023_v24, %v2031_v31  ;;  %v2041_v24 = vmax.f32 %v2025_v13, %v2033_v7 }
 0x83b   :  { %v2010_v37 = vpop.permute.xlu1 %2009  ;;  %v5389_v52 = vadd.f32 %v5386_v34, %v1755_v56  ;;  %v5399_v20 = vadd.f32 %v5396_v39, %v1758_v62  ;;  %v1749_v33 = vmul.f32 0.2, %v1741_v63  ;;  %v5412_v27 = vadd.f32 %v5321_v4, %v2037_v1 }
 0x83c   :  { %v2040_v44 = vmax.f32 %v2024_v3, %v2032_v38  ;;  %v2026_v56 = vadd.f32 %v5314_v30, %v2010_v37  ;;  %v2058_v62 = vsel %vm682_vm5, %v5402_v25, -inf  ;;  %v5438_v1 = vadd.f32 %v5371_v42, %v2041_v24 }
 0x83d   :  { %v1779_v5 = vsel %vm682_vm5, %v5389_v52, -inf  ;;  %v2014_v14 = vpop.permute.xlu0 %2013  ;;  %v1788_v51 = vsel %vm682_vm5, %v5399_v20, -inf  ;;  %v1757_v38 = vmax.f32 %v1741_v63, %v1749_v33  ;;  %v2055_v31 = vsel %vm682_vm5, %v5412_v27, -inf }
 0x83e   :  { %1783 = vmax.xlane.f32.xlu1 %v1782_v17  ;;  %1780 = vmax.xlane.f32.xlu0 %v1779_v5  ;;  %v2034_v3 = vmul.f32 0.2, %v2026_v56  ;;  %v2027_v37 = vadd.f32 %v5314_v30, %v2014_v14  ;;  %v5416_v8 = vadd.f32 %v5386_v34, %v2040_v44  ;;  %v5421_v17 = vadd.f32 %v5354_v23, %v2039_v48  ;;  %v5428_v30 = vld [vmem:[%s5893_s3 + $0x30] sm:$0xff] }
 0x83f   :  { %v2067_v33 = vsel %vm682_vm5, %v5438_v1, -inf  ;;  %v5896_v48 = vpack.i.bf16 %v5241_v11, %v5243_v46 }
 0x840   :  { %v2042_v5 = vmax.f32 %v2026_v56, %v2034_v3  ;;  %v2035_v35 = vmul.f32 0.2, %v2027_v37  ;;  %v2064_v4 = vsel %vm682_vm5, %v5416_v8, -inf  ;;  %v2061_v7 = vsel %vm682_vm5, %v5421_v17, -inf }
 0x842   :  { %1789 = vmax.xlane.f32.xlu1 %v1788_v51  ;;  %2059 = vmax.xlane.f32.xlu0 %v2058_v62  ;;  %v5431_v51 = vadd.f32 %v5428_v30, %v1757_v38  ;;  %v2043_v63 = vmax.f32 %v2027_v37, %v2035_v35  ;;  %v5441_v44 = vadd.f32 %v5428_v30, %v2042_v5 }
 0x844   :  { %v1785_v13 = vsel %vm682_vm5, %v5431_v51, -inf  ;;  %v2070_v56 = vsel %vm682_vm5, %v5441_v44, -inf  ;;  %v5448_v14 = vadd.f32 %v5396_v39, %v2043_v63 }
 0x846   :  { %2056 = vmax.xlane.f32.xlu1 %v2055_v31  ;;  %2065 = vmax.xlane.f32.xlu0 %v2064_v4  ;;  %v2073_v35 = vsel %vm682_vm5, %v5448_v14, -inf }
 0x84a   :  { %2062 = vmax.xlane.f32.xlu1 %v2061_v7  ;;  %1786 = vmax.xlane.f32.xlu0 %v1785_v13 }
 0x84e   :  { %2068 = vmax.xlane.f32.xlu1 %v2067_v33  ;;  %2071 = vmax.xlane.f32.xlu0 %v2070_v56 }
 0x852   :  { %2074 = vmax.xlane.f32.xlu1 %v2073_v35 }
 0x864   :  { %4296 = vrot.lane.b32.xlu0 %v5896_v48, %s4515_s30 }
 0x8b5   :  { %v1772_v62 = vpop.xlane.xlu0 %1771 }
 0x8b6   :  { %v1792_v38 = vsub.f32 %v5324_v16, %v1772_v62 }
 0x8b8   :  { %v1801_v3 = vmul.f32 1.442695, %v1792_v38 }
 0x8b9   :  { %v2054_v37 = vpop.xlane.xlu0 %2053 }
 0x8ba   :  { %4381 = vpow2.f32 %v1801_v3  ;;  %v2076_v24 = vsub.f32 %v5334_v58, %v2054_v37 }
 0x8bc   :  { %v2084_v63 = vmul.f32 1.442695, %v2076_v24 }
 0x8c3   :  { %v1769_v31 = vpop.xlane.xlu1 %1768 }
 0x8c4   :  { %v5458_v5 = vpop.eup %4381  ;;  %v1791_v4 = vsub.f32 %v5344_v28, %v1769_v31 }
 0x8c5   :  { %v1818_v7 = vsel %vm682_vm5, %v5458_v5, 0.0 }
 0x8c6   :  { %v1799_v13 = vmul.f32 1.442695, %v1791_v4  ;;  %1819 = vadd.xlane.f32.xlu1 %v1818_v7 }
 0x8c7   :  { %v1778_v11 = vpop.xlane.xlu1 %1777  ;;  %v1775_v46 = vpop.xlane.xlu0 %1774 }
 0x8c8   :  { %4383 = vpow2.f32 %v1799_v13  ;;  %v1793_v16 = vsub.f32 %v5366_v43, %v1775_v46  ;;  %v1794_v3 = vsub.f32 %v5357_v0, %v1778_v11 }
 0x8c9   :  { %4385 = vpow2.f32 %v2084_v63 }
 0x8ca   :  { %v1803_v33 = vmul.f32 1.442695, %v1793_v16 }
 0x8cb   :  { %v1784_v56 = vpop.xlane.xlu1 %1783  ;;  %v1781_v58 = vpop.xlane.xlu0 %1780 }
 0x8cc   :  { %4387 = vpow2.f32 %v1803_v33  ;;  %v1795_v35 = vsub.f32 %v5389_v52, %v1781_v58 }
 0x8ce   :  { %v1807_v24 = vmul.f32 1.442695, %v1795_v35 }
 0x8cf   :  { %v1790_v48 = vpop.xlane.xlu1 %1789  ;;  %v2060_v28 = vpop.xlane.xlu0 %2059 }
 0x8d0   :  { %v2078_v62 = vsub.f32 %v5402_v25, %v2060_v28  ;;  %v1805_v25 = vmul.f32 1.442695, %v1794_v3 }
 0x8d2   :  { %v5466_v38 = vpop.eup %4383  ;;  %v2088_v37 = vmul.f32 1.442695, %v2078_v62 }
 0x8d3   :  { %v2057_v31 = vpop.xlane.xlu1 %2056  ;;  %v2066_v4 = vpop.xlane.xlu0 %2065  ;;  %v1815_v43 = vsel %vm682_vm5, %v5466_v38, 0.0 }
 0x8d4   :  { %v5471_v7 = vpop.eup %4385  ;;  %v2077_v63 = vsub.f32 %v5412_v27, %v2057_v31  ;;  %v2080_v52 = vsub.f32 %v5416_v8, %v2066_v4  ;;  %1816 = vadd.xlane.f32.xlu0 %v1815_v43  ;;  %4389 = vpow2.f32 %v2088_v37  ;;  %v1796_v8 = vsub.f32 %v5374_v50, %v1784_v56 }
 0x8d5   :  { %4391 = vpow2.f32 %v1807_v24  ;;  %v2100_v11 = vsel %vm682_vm5, %v5471_v7, 0.0 }
 0x8d6   :  { %v2086_v13 = vmul.f32 1.442695, %v2077_v63  ;;  %v5477_v16 = vpop.eup %4387  ;;  %v2092_v33 = vmul.f32 1.442695, %v2080_v52  ;;  %v1809_v24 = vmul.f32 1.442695, %v1796_v8  ;;  %v1798_v52 = vsub.f32 %v5399_v20, %v1790_v48 }
 0x8d7   :  { %v2063_v46 = vpop.xlane.xlu1 %2062  ;;  %v1787_v0 = vpop.xlane.xlu0 %1786  ;;  %v1821_v3 = vsel %vm682_vm5, %v5477_v16, 0.0 }
 0x8d8   :  { %4393 = vpow2.f32 %v2086_v13  ;;  %v2079_v58 = vsub.f32 %v5421_v17, %v2063_v46  ;;  %v1797_v27 = vsub.f32 %v5431_v51, %v1787_v0  ;;  %2101 = vadd.xlane.f32.xlu0 %v2100_v11 }
 0x8d9   :  { %4395 = vpow2.f32 %v1805_v25 }
 0x8da   :  { %v2090_v35 = vmul.f32 1.442695, %v2079_v58  ;;  %4397 = vpow2.f32 %v2092_v33  ;;  %v1811_v37 = vmul.f32 1.442695, %v1797_v27  ;;  %v1813_v58 = vmul.f32 1.442695, %v1798_v52 }
 0x8db   :  { %v2069_v28 = vpop.xlane.xlu1 %2068  ;;  %v2072_v62 = vpop.xlane.xlu0 %2071 }
 0x8dc   :  { %1822 = vadd.xlane.f32.xlu0 %v1821_v3  ;;  %4399 = vpow2.f32 %v2090_v35  ;;  %v2081_v31 = vsub.f32 %v5438_v1, %v2069_v28  ;;  %v2082_v28 = vsub.f32 %v5441_v44, %v2072_v62 }
 0x8dd   :  { %4401 = vpow2.f32 %v1811_v37 }
 0x8de   :  { %v5485_v17 = vpop.eup %4389  ;;  %4403 = vpow2.f32 %v1809_v24  ;;  %v2094_v25 = vmul.f32 1.442695, %v2081_v31  ;;  %v2096_v31 = vmul.f32 1.442695, %v2082_v28 }
 0x8df   :  { %v4297_v51 = vpop.permute.xlu0 %4296  ;;  %v5487_v50 = vpop.eup %4391  ;;  %v2106_v56 = vsel %vm682_vm5, %v5485_v17, 0.0 }
 0x8e0   :  { %v4299_v4 = vunpack.i.h.bf16 %v4297_v51  ;;  %v4298_v43 = vunpack.i.l.bf16 %v4297_v51  ;;  %2107 = vadd.xlane.f32.xlu0 %v2106_v56  ;;  %v2075_v1 = vpop.xlane.xlu1 %2074  ;;  %v1827_v11 = vsel %vm682_vm5, %v5487_v50, 0.0  ;;  %4405 = vpow2.f32 %v2094_v25 }
 0x8e1   :  { %v2083_v20 = vsub.f32 %v5448_v14, %v2075_v1  ;;  %4407 = vpow2.f32 %v1813_v58  ;;  %v5899_v58 = vpack.i.bf16 %v5251_v36, %v5255_v21 }
 0x8e2   :  { %v5491_v63 = vpop.eup %4393  ;;  %v4168_v13 = vpack.c.bf16 %v4299_v4, %v4298_v43 }
 0x8e3   :  { %v2103_v46 = vsel %vm682_vm5, %v5491_v63, 0.0  ;;  %v5496_v0 = vpop.eup %4395  ;;  %v2098_v3 = vmul.f32 1.442695, %v2083_v20 }
 0x8e4   :  { %2104 = vadd.xlane.f32.xlu1 %v2103_v46  ;;  %4169 = vmatprep.subr.bf16.mxu1 %v4168_v13  ;;  %v5500_v33 = vpop.eup %4397  ;;  %v1824_v48 = vsel %vm682_vm5, %v5496_v0, 0.0  ;;  %v5897_v46 = vpack.i.bf16 %v5266_v6, %v5270_v19 }
 0x8e5   :  { %1828 = vadd.xlane.f32.xlu0 %v1827_v11  ;;  %v2112_v8 = vsel %vm682_vm5, %v5500_v33, 0.0  ;;  %4409 = vpow2.f32 %v2098_v3  ;;  %v5898_v11 = vpack.i.bf16 %v5278_v12, %v5282_v26 }
 0x8e6   :  { %v5505_v27 = vpop.eup %4399  ;;  %4411 = vpow2.f32 %v2096_v31 }
 0x8e7   :  { %v5509_v35 = vpop.eup %4401  ;;  %v2109_v14 = vsel %vm682_vm5, %v5505_v27, 0.0 }
 0x8e8   :  { %1825 = vadd.xlane.f32.xlu1 %v1824_v48  ;;  %v5514_v37 = vpop.eup %4403  ;;  %v1833_v24 = vsel %vm682_vm5, %v5509_v35, 0.0 }
 0x8e9   :  { %2113 = vadd.xlane.f32.xlu0 %v2112_v8  ;;  %v1830_v51 = vsel %vm682_vm5, %v5514_v37, 0.0 }
 0x8ea   :  { %v5520_v4 = vpop.eup %4405 }
 0x8eb   :  { %v2115_v44 = vsel %vm682_vm5, %v5520_v4, 0.0  ;;  %v5524_v62 = vpop.eup %4407 }
 0x8ec   :  { %2110 = vadd.xlane.f32.xlu1 %v2109_v14  ;;  %v1836_v43 = vsel %vm682_vm5, %v5524_v62, 0.0 }
 0x8ed   :  { %1834 = vadd.xlane.f32.xlu0 %v1833_v24 }
 0x8ef   :  { %v5528_v56 = vpop.eup %4409 }
 0x8f0   :  { %1831 = vadd.xlane.f32.xlu1 %v1830_v51  ;;  %v2121_v52 = vsel %vm682_vm5, %v5528_v56, 0.0  ;;  %v5532_v25 = vpop.eup %4411 }
 0x8f1   :  { %v2118_v1 = vsel %vm682_vm5, %v5532_v25, 0.0 }
 0x8f4   :  { %2116 = vadd.xlane.f32.xlu1 %v2115_v44 }
 0x8f8   :  { %1837 = vadd.xlane.f32.xlu1 %v1836_v43 }
 0x8fc   :  { %2122 = vadd.xlane.f32.xlu1 %v2121_v52 }
 0x900   :  { %2119 = vadd.xlane.f32.xlu1 %v2118_v1 }
 0x903   :  { %4306 = vrot.lane.b32.xlu0 %v5897_v46, %s4515_s30 }
 0x907   :  { %4311 = vrot.lane.b32.xlu0 %v5898_v11, %s4515_s30 }
 0x911   :  { %4301 = vrot.lane.b32.xlu1 %v5899_v58, %s4515_s30  ;;  %s5902_s30 = sld [smem:[#allocation11_spill]] }
 0x953   :  { %v1820_v20 = vpop.xlane.xlu1 %1819 }
 0x954   :  { %4413 = vrcp.f32 %v1820_v20 }
 0x95e   :  { %v4414_v3 = vpop.eup %4413 }
 0x95f   :  { %v1848_v14 = vmul.f32 %v4414_v3, %v5458_v5 }
 0x961   :  { %v1817_v48 = vpop.xlane.xlu0 %1816 }
 0x962   :  { %4415 = vrcp.f32 %v1817_v48 }
 0x965   :  { %v2102_v8 = vpop.xlane.xlu0 %2101 }
 0x969   :  { %v1823_v28 = vpop.xlane.xlu0 %1822 }
 0x96a   :  { %4417 = vrcp.f32 %v1823_v28 }
 0x96c   :  { %v4416_v6 = vpop.eup %4415 }
 0x96d   :  { %v1847_v19 = vmul.f32 %v4416_v6, %v5466_v38  ;;  %v2108_v12 = vpop.xlane.xlu0 %2107 }
 0x96f   :  { %3888 = vmatprep.mubr.msk.f32.mxu1 %vm682_vm5, %v1847_v19 }
 0x970   :  { %3889 = vmatmul.mubr.msk.f32.vlgmr.msra.gmra.mrb[26].mxu1 %vm682_vm5, %v1848_v14 }
 0x971   :  { %4171 = vmatpush3.bf16.msra.mxu1 %v4168_v13  ;;  %v2105_v36 = vpop.xlane.xlu1 %2104 }
 0x972   :  { %v1829_v21 = vpop.xlane.xlu0 %1828 }
 0x973   :  { %4419 = vrcp.f32 %v1829_v21 }
 0x974   :  { %v4418_v26 = vpop.eup %4417 }
 0x975   :  { %v1826_v24 = vpop.xlane.xlu1 %1825  ;;  %v1849_v31 = vmul.f32 %v4418_v26, %v5477_v16 }
 0x976   :  { %4421 = vrcp.f32 %v1826_v24  ;;  %v2114_v51 = vpop.xlane.xlu0 %2113 }
 0x977   :  { %3891 = vmatprep.mubr.msk.f32.mxu1 %vm682_vm5, %v1849_v31 }
 0x979   :  { %v2111_v38 = vpop.xlane.xlu1 %2110 }
 0x97a   :  { %v1835_v44 = vpop.xlane.xlu0 %1834 }
 0x97b   :  { %4423 = vrcp.f32 %v1835_v44 }
 0x97d   :  { %v1832_v5 = vpop.xlane.xlu1 %1831  ;;  %v4420_v43 = vpop.eup %4419 }
 0x97e   :  { %4425 = vrcp.f32 %v1832_v5  ;;  %v1851_v46 = vmul.f32 %v4420_v43, %v5487_v50 }
 0x97f   :  { %4427 = vrcp.f32 %v2102_v8 }
 0x980   :  { %v4422_v52 = vpop.eup %4421 }
 0x981   :  { %v2117_v1 = vpop.xlane.xlu1 %2116  ;;  %v1850_v13 = vmul.f32 %v4422_v52, %v5496_v0  ;;  %v4307_v0 = vpop.permute.xlu0 %4306  ;;  %v5900_v52 = vmov 0.0|0.0  }
 0x982   :  { %v4309_v21 = vunpack.i.h.bf16 %v4307_v0  ;;  %v4308_v26 = vunpack.i.l.bf16 %v4307_v0 }
 0x983   :  { %3892 = vmatmul.mubr.msk.f32.gmra.mrb[28].mxu1 %vm682_vm5, %v1850_v13 }
 0x984   :  { %3894 = vmatprep.mubr.msk.f32.mxu1 %vm682_vm5, %v1851_v46  ;;  %v4176_v44 = vpack.c.bf16 %v4309_v21, %v4308_v26 }
 0x985   :  { %v1838_v16 = vpop.xlane.xlu1 %1837  ;;  %v4424_v11 = vpop.eup %4423 }
 0x986   :  { %4429 = vrcp.f32 %v1838_v16  ;;  %v1853_v28 = vmul.f32 %v4424_v11, %v5509_v35 }
 0x987   :  { %4431 = vrcp.f32 %v2105_v36 }
 0x988   :  { %v4426_v58 = vpop.eup %4425  ;;  %4433 = vrcp.f32 %v2108_v12 }
 0x989   :  { %v2123_v20 = vpop.xlane.xlu1 %2122  ;;  %v1852_v48 = vmul.f32 %v4426_v58, %v5514_v37  ;;  %v4428_v3 = vpop.eup %4427  ;;  %4435 = vrcp.f32 %v2111_v38 }
 0x98a   :  { %v2132_v14 = vmul.f32 %v4428_v3, %v5471_v7  ;;  %v4312_v37 = vpop.permute.xlu0 %4311  ;;  %4437 = vrcp.f32 %v2114_v51 }
 0x98b   :  { %3895 = vmatmul.mubr.msk.f32.gmra.mrb[30].mxu1 %vm682_vm5, %v1852_v48  ;;  %v4314_v5 = vunpack.i.h.bf16 %v4312_v37  ;;  %v4313_v43 = vunpack.i.l.bf16 %v4312_v37  ;;  %4439 = vrcp.f32 %v2117_v1 }
 0x98c   :  { %3897 = vmatprep.mubr.msk.f32.mxu1 %vm682_vm5, %v1853_v28 }
 0x98d   :  { %v2120_v50 = vpop.xlane.xlu1 %2119  ;;  %v4180_v7 = vpack.c.bf16 %v4314_v5, %v4313_v43 }
 0x98e   :  { %4441 = vrcp.f32 %v2120_v50 }
 0x98f   :  { %4443 = vrcp.f32 %v2123_v20 }
 0x990   :  { %v4430_v6 = vpop.eup %4429 }
 0x991   :  { %v4302_v8 = vpop.permute.xlu1 %4301  ;;  %v1854_v19 = vmul.f32 %v4430_v6, %v5524_v62  ;;  %v4432_v62 = vpop.eup %4431  ;;  %v2386_v6 = vld [vmem:[%s5853_s22 + $0x8] sm:$0xff] }
 0x992   :  { %v4304_v24 = vunpack.i.h.bf16 %v4302_v8  ;;  %v4303_v31 = vunpack.i.l.bf16 %v4302_v8  ;;  %v4434_v36 = vpop.eup %4433  ;;  %v2133_v12 = vmul.f32 %v4432_v62, %v5491_v63  ;;  %v2391_v62 = vld [vmem:[%s5855_s24 + $0x8] sm:$0xff] }
 0x993   :  { %3898 = vmatmul.mubr.msk.f32.gmra.mrb[32].mxu1 %vm682_vm5, %v1854_v19  ;;  %v4436_v13 = vpop.eup %4435  ;;  %v2134_v46 = vmul.f32 %v4434_v36, %v5485_v17  ;;  %v2387_v19 = vld [vmem:[%s5853_s22 + $0x10] sm:$0xff] }
 0x994   :  { %v4172_v35 = vpack.c.bf16 %v4304_v24, %v4303_v31  ;;  %3916 = vmatprep.mubr.msk.f32.mxu1 %vm682_vm5, %v2132_v14  ;;  %v4438_v38 = vpop.eup %4437  ;;  %v2135_v51 = vmul.f32 %v4436_v13, %v5505_v27  ;;  %v5901_v27 = vmov 0.0   ;;  %v2388_v14 = vld [vmem:[%s5853_s22 + $0x18] sm:$0xff]  ;;  %v3434_v13 = vld [vmem:[%s5851_s20] ss:$0 sm:$0xff] }
 0x995   :  { %v4440_v1 = vpop.eup %4439  ;;  %v2136_v16 = vmul.f32 %v4438_v38, %v5500_v33  ;;  %v4188_v21 = vpack.c.bf16 %v2388_v14, %v2387_v19 }
 0x996   :  { %4173 = vmatprep.subr.bf16.mxu1 %v4172_v35  ;;  %v2137_v63 = vmul.f32 %v4440_v1, %v5520_v4 }
 0x997   :  { %4175 = vmatpush3.bf16.msra.mxu1 %v4172_v35 }
 0x998   :  { %4177 = vmatprep.subr.bf16.mxu1 %v4176_v44  ;;  %v4442_v11 = vpop.eup %4441 }
 0x999   :  { %v4444_v58 = vpop.eup %4443  ;;  %v2138_v17 = vmul.f32 %v4442_v11, %v5532_v25 }
 0x99a   :  { %v2139_v20 = vmul.f32 %v4444_v58, %v5528_v56  ;;  %v2385_v56 = vld [vmem:[%s5853_s22] sm:$0xff] }
 0x99b   :  { %4179 = vmatpush3.bf16.msra.mxu1 %v4176_v44  ;;  %v4184_v8 = vpack.c.bf16 %v2386_v6, %v2385_v56 }
 0x99c   :  { %4181 = vmatprep.subr.bf16.mxu1 %v4180_v7 }
 0x99d   :  { %4185 = vmatprep.subr.bf16.mxu0 %v4184_v8 }
 0x99e   :  { %4187 = vmatpush3.bf16.msra.mxu0 %v4184_v8 }
 0x99f   :  { %4183 = vmatpush3.bf16.msra.mxu1 %v4180_v7  ;;  %4189 = vmatprep.subr.bf16.mxu0 %v4188_v21  ;;  %v2390_v7 = vld [vmem:[%s5855_s24] sm:$0xff] }
 0x9a0   :  { %4200 = vmatprep.subr.bf16.mxu1 %v5900_v52  ;;  %v4192_v36 = vpack.c.bf16 %v2391_v62, %v2390_v7 }
 0x9a2   :  { %3917 = vmatmul.mubr.msk.f32.vlgmr.msra.gmra.mrb[34].mxu1 %vm682_vm5, %v2133_v12  ;;  %4191 = vmatpush3.bf16.msra.mxu0 %v4188_v21 }
 0x9a3   :  { %3919 = vmatprep.mubr.msk.f32.mxu1 %vm682_vm5, %v2134_v46  ;;  %4193 = vmatprep.subr.bf16.mxu0 %v4192_v36 }
 0x9a6   :  { %3920 = vmatmul.mubr.msk.f32.gmra.mrb[36].mxu1 %vm682_vm5, %v2135_v51 }
 0x9a7   :  { %3922 = vmatprep.mubr.msk.f32.mxu1 %vm682_vm5, %v2136_v16  ;;  %v3435_v16 = vld [vmem:[%s5852_s21] ss:$0 sm:$0xff] }
 0x9aa   :  { %3923 = vmatmul.mubr.msk.f32.gmra.mrb[38].mxu1 %vm682_vm5, %v2137_v63 }
 0x9ab   :  { %3925 = vmatprep.mubr.msk.f32.mxu1 %vm682_vm5, %v2138_v17 }
 0x9ae   :  { %3926 = vmatmul.mubr.msk.f32.gmra.mrb[40].mxu1 %vm682_vm5, %v2139_v20 }
 0x9af   :  { %3984 = vmatprep.mubr.msk.f32.mxu1 %vm4511_vm3, %v5901_v27 }
 0xa43   :  { %v3890_v33 = vpop.f32.mrb[26].mxu1 }
 0xa44   :  { %v1945_v48 = vpop.f32.mrb[27].mxu1 }
 0xa56   :  { %v3893_v28 = vpop.f32.mrb[28].mxu1 }
 0xa57   :  { %v1955_v0 = vpop.f32.mrb[29].mxu1 }
 0xa5e   :  { %v3896_v50 = vpop.f32.mrb[30].mxu1 }
 0xa5f   :  { %v5583_v4 = vpop.f32.mrb[31].mxu1 }
 0xa66   :  { %v5585_v3 = vpop.f32.mrb[32].mxu1 }
 0xa67   :  { %v5587_v25 = vpop.f32.mrb[33].mxu1 }
 0xa75   :  { %v3918_v26 = vpop.f32.mrb[34].mxu1 }
 0xa76   :  { %2303 = vrot.lane.b32.xlu0 %v3918_v26, %s4516_s5  ;;  %v2254_v24 = vpop.f32.mrb[35].mxu1 }
 0xa77   :  { %2301 = vrot.lane.b32.xlu1 %v2254_v24, %s4516_s5 }
 0xa79   :  { %v3921_v31 = vpop.f32.mrb[36].mxu1 }
 0xa7a   :  { %2307 = vrot.lane.b32.xlu0 %v3921_v31, %s4516_s5  ;;  %v2264_v37 = vpop.f32.mrb[37].mxu1 }
 0xa7b   :  { %2305 = vrot.lane.b32.xlu1 %v2264_v37, %s4516_s5 }
 0xa7d   :  { %v3924_v35 = vpop.f32.mrb[38].mxu1 }
 0xa7e   :  { %2311 = vrot.lane.b32.xlu0 %v3924_v35, %s4516_s5  ;;  %v2274_v44 = vpop.f32.mrb[39].mxu1 }
 0xa7f   :  { %2309 = vrot.lane.b32.xlu1 %v2274_v44, %s4516_s5  ;;  %v2393_v44 = vld [vmem:[%s5855_s24 + $0x18] sm:$0xff] }
 0xa81   :  { %v3927_v5 = vpop.f32.mrb[40].mxu1 }
 0xa82   :  { %2315 = vrot.lane.b32.xlu0 %v3927_v5, %s4516_s5  ;;  %v2284_v43 = vpop.f32.mrb[41].mxu1 }
 0xa83   :  { %2313 = vrot.lane.b32.xlu1 %v2284_v43, %s4516_s5 }
 0xae8   :  { %v2304_v12 = vpop.permute.xlu0 %2303 }
 0xae9   :  { %v2326_v46 = vsel %vm1241_vm6, %v3890_v33, %v2304_v12  ;;  %v2302_v38 = vpop.permute.xlu1 %2301 }
 0xaea   :  { %v2334_v51 = vmul.f32 %v2326_v46, %v5156_v55  ;;  %v2325_v1 = vsel %vm1241_vm6, %v1945_v48, %v2302_v38 }
 0xaeb   :  { %v2333_v11 = vmul.f32 %v2325_v1, %v5150_v41 }
 0xaec   :  { %v2348_v63 = vmul.f32 %v3434_v13, %v2334_v51  ;;  %v2308_v58 = vpop.permute.xlu0 %2307 }
 0xaed   :  { %v2347_v17 = vmul.f32 %v3434_v13, %v2333_v11  ;;  %v2328_v20 = vsel %vm1241_vm6, %v3893_v28, %v2308_v58  ;;  %v2306_v56 = vpop.permute.xlu1 %2305  ;;  %v2392_v28 = vld [vmem:[%s5855_s24 + $0x10] sm:$0xff] }
 0xaee   :  { %v2362_v6 = vadd.f32 %v3435_v16, %v2348_v63  ;;  %v2336_v33 = vmul.f32 %v2328_v20, %v5154_v2  ;;  %v2327_v8 = vsel %vm1241_vm6, %v1955_v0, %v2306_v56  ;;  %v4196_v1 = vpack.c.bf16 %v2393_v44, %v2392_v28 }
 0xaef   :  { %v2361_v19 = vadd.f32 %v3435_v16, %v2347_v17  ;;  %v2335_v48 = vmul.f32 %v2327_v8, %v5152_v10 }
 0xaf0   :  { %v2370_v14 = vmax.f32 %v2362_v6, 0.0  ;;  %v2350_v21 = vmul.f32 %v3434_v13, %v2336_v33  ;;  %v2312_v26 = vpop.permute.xlu0 %2311 }
 0xaf1   :  { %v2369_v24 = vmax.f32 %v2361_v19, 0.0  ;;  %v2349_v31 = vmul.f32 %v3434_v13, %v2335_v48  ;;  %v2330_v37 = vsel %vm1241_vm6, %v3896_v50, %v2312_v26  ;;  %v2310_v35 = vpop.permute.xlu1 %2309 }
 0xaf2   :  { %v2364_v0 = vadd.f32 %v3435_v16, %v2350_v21  ;;  %v2338_v5 = vmul.f32 %v2330_v37, %v5158_v57  ;;  %v2329_v43 = vsel %vm1241_vm6, %v5583_v4, %v2310_v35  ;;  %v5644_v12 = vadd.f32 %v2370_v14, %v5196_v47 }
 0xaf3   :  { %v2363_v7 = vadd.f32 %v3435_v16, %v2349_v31  ;;  %v2337_v62 = vmul.f32 %v2329_v43, %v5160_v60  ;;  %v5641_v50 = vadd.f32 %v2369_v24, %v5193_v32 }
 0xaf4   :  { %v2372_v46 = vmax.f32 %v2364_v0, 0.0  ;;  %v2352_v38 = vmul.f32 %v3434_v13, %v2338_v5  ;;  %v2316_v51 = vpop.permute.xlu0 %2315 }
 0xaf5   :  { %v2371_v11 = vmax.f32 %v2363_v7, 0.0  ;;  %v2351_v63 = vmul.f32 %v3434_v13, %v2337_v62  ;;  %v2332_v58 = vsel %vm1241_vm6, %v5585_v3, %v2316_v51  ;;  %3936 = vmatprep.mubr.msk.f32.mxu0 %vm274_vm2, %v5641_v50  ;;  %v2314_v4 = vpop.permute.xlu1 %2313 }
 0xaf6   :  { %v2366_v17 = vadd.f32 %v3435_v16, %v2352_v38  ;;  %v2340_v32 = vmul.f32 %v2332_v58, %v5162_v61  ;;  %v2331_v47 = vsel %vm1241_vm6, %v5587_v25, %v2314_v4  ;;  %3937 = vmatmul.mubr.msk.f32.vlgmr.msra.gmra.mrb[34].mxu0 %vm274_vm2, %v5644_v12  ;;  %v5660_v8 = vadd.f32 %v2372_v46, %v5212_v59 }
 0xaf7   :  { %v2365_v20 = vadd.f32 %v3435_v16, %v2351_v63  ;;  %v2339_v56 = vmul.f32 %v2331_v47, %v5164_v49  ;;  %v5657_v6 = vadd.f32 %v2371_v11, %v5209_v22  ;;  %4195 = vmatpush3.bf16.msra.mxu0 %v4192_v36  ;;  %v2394_v63 = vld [vmem:[%s5856_s25] sm:$0x1] }
 0xaf8   :  { %v2374_v3 = vmax.f32 %v2366_v17, 0.0  ;;  %v2354_v33 = vmul.f32 %v3434_v13, %v2340_v32  ;;  %4197 = vmatprep.subr.bf16.mxu0 %v4196_v1 }
 0xaf9   :  { %v2373_v19 = vmax.f32 %v2365_v20, 0.0  ;;  %v2353_v48 = vmul.f32 %v3434_v13, %v2339_v56  ;;  %3939 = vmatprep.mubr.msk.f32.mxu0 %vm274_vm2, %v5657_v6 }
 0xafa   :  { %v2368_v25 = vadd.f32 %v3435_v16, %v2354_v33  ;;  %3940 = vmatmul.mubr.msk.f32.gmra.mrb[36].mxu0 %vm274_vm2, %v5660_v8  ;;  %v5670_v21 = vadd.f32 %v2374_v3, %v5222_v40 }
 0xafb   :  { %v2367_v14 = vadd.f32 %v3435_v16, %v2353_v48  ;;  %v5667_v22 = vadd.f32 %v2373_v19, %v5219_v29  ;;  %4199 = vmatpush3.bf16.msra.mxu0 %v4196_v1  ;;  %v3436_v29 = vld [vmem:[%s5854_s23] ss:$0 sm:$0xff] }
 0xafc   :  { %v2376_v36 = vmax.f32 %v2368_v25, 0.0 }
 0xafd   :  { %v2375_v59 = vmax.f32 %v2367_v14, 0.0  ;;  %3942 = vmatprep.mubr.msk.f32.mxu0 %vm274_vm2, %v5667_v22 }
 0xafe   :  { %3943 = vmatmul.mubr.msk.f32.gmra.mrb[38].mxu0 %vm274_vm2, %v5670_v21  ;;  %v5680_v16 = vadd.f32 %v2376_v36, %v5232_v53 }
 0xaff   :  { %v5677_v13 = vadd.f32 %v2375_v59, %v5229_v54 }
 0xb01   :  { %3945 = vmatprep.mubr.msk.f32.mxu0 %vm274_vm2, %v5677_v13 }
 0xb02   :  { %3946 = vmatmul.mubr.msk.f32.gmra.mrb[40].mxu0 %vm274_vm2, %v5680_v16 }
 0xbc9   :  { %v3938_v40 = vpop.f32.mrb[34].mxu0 }
 0xbca   :  { %v2499_v26 = vadd.f32 %v3938_v40, %v3436_v29  ;;  %v2493_v24 = vpop.f32.mrb[35].mxu0 }
 0xbcb   :  { %v2494_v31 = vadd.f32 %v3436_v29, %v2493_v24 }
 0xbcd   :  { %v4201_v37 = vpack.c.bf16 %v2499_v26, %v2494_v31  ;;  %v3941_v54 = vpop.f32.mrb[36].mxu0  ;;  %3956 = vmatprep.mubr.msk.f32.mxu0 %vm274_vm2, %v2494_v31 }
 0xbce   :  { %v2509_v53 = vadd.f32 %v3941_v54, %v3436_v29  ;;  %v2503_v35 = vpop.f32.mrb[37].mxu0  ;;  %3957 = vmatmul.mubr.msk.f32.vlgmr.msra.gmra.mrb[42].mxu0 %vm274_vm2, %v2499_v26 }
 0xbcf   :  { %v2504_v28 = vadd.f32 %v3436_v29, %v2503_v35  ;;  %4203 = vmatpush3.bf16.xpose.msk.msra.mxu1 %vm4769_vm4, %v4201_v37  ;;  %4217 = vmatprep.subr.bf16.mxu0 %v4201_v37 }
 0xbd0   :  { %4219 = vmatpush3.bf16.msra.mxu0 %v4201_v37  ;;  %4204 = vmatprep.subr.bf16.mxu1 %v5900_v52  ;;  %v4485_v37 = vld [vmem:[%s5893_s3 + $0x8] sm:$0xff]  ;;  %s5906_s3 = sld [smem:[#allocation14_spill]] }
 0xbd1   :  { %v4205_v44 = vpack.c.bf16 %v2509_v53, %v2504_v28  ;;  %v3944_v0 = vpop.f32.mrb[38].mxu0  ;;  %3959 = vmatprep.mubr.msk.f32.mxu0 %vm274_vm2, %v2504_v28 }
 0xbd2   :  { %v2519_v5 = vadd.f32 %v3944_v0, %v3436_v29  ;;  %v2513_v43 = vpop.f32.mrb[39].mxu0  ;;  %3960 = vmatmul.mubr.msk.f32.gmra.mrb[44].mxu0 %vm274_vm2, %v2509_v53 }
 0xbd3   :  { %v2514_v7 = vadd.f32 %v3436_v29, %v2513_v43  ;;  %4221 = vmatprep.subr.bf16.mxu0 %v4205_v44 }
 0xbd4   :  { %4223 = vmatpush3.bf16.msra.mxu0 %v4205_v44 }
 0xbd5   :  { %v4209_v62 = vpack.c.bf16 %v2519_v5, %v2514_v7  ;;  %v3947_v46 = vpop.f32.mrb[40].mxu0  ;;  %3962 = vmatprep.mubr.msk.f32.mxu0 %vm274_vm2, %v2514_v7 }
 0xbd6   :  { %v2529_v38 = vadd.f32 %v3947_v46, %v3436_v29  ;;  %v2523_v51 = vpop.f32.mrb[41].mxu0  ;;  %3963 = vmatmul.mubr.msk.f32.gmra.mrb[46].mxu0 %vm274_vm2, %v2519_v5 }
 0xbd7   :  { %v2524_v1 = vadd.f32 %v3436_v29, %v2523_v51  ;;  %4207 = vmatpush3.bf16.xpose.msk.msra.mxu1 %vm4769_vm4, %v4205_v44  ;;  %4225 = vmatprep.subr.bf16.mxu0 %v4209_v62 }
 0xbd8   :  { %4227 = vmatpush3.bf16.msra.mxu0 %v4209_v62  ;;  %4208 = vmatprep.subr.bf16.mxu1 %v5900_v52 }
 0xbd9   :  { %v4213_v11 = vpack.c.bf16 %v2529_v38, %v2524_v1  ;;  %3965 = vmatprep.mubr.msk.f32.mxu0 %vm274_vm2, %v2524_v1 }
 0xbda   :  { %3966 = vmatmul.mubr.msk.f32.gmra.mrb[48].mxu0 %vm274_vm2, %v2529_v38 }
 0xbdb   :  { %4229 = vmatprep.subr.bf16.mxu0 %v4213_v11 }
 0xbdc   :  { %4231 = vmatpush3.bf16.msra.mxu0 %v4213_v11 }
 0xbdd   :  { %4232 = vmatprep.subr.bf16.mxu0 %v5900_v52 }
 0xbdf   :  { %4211 = vmatpush3.bf16.xpose.msk.msra.mxu1 %vm4769_vm4, %v4209_v62 }
 0xbe0   :  { %4212 = vmatprep.subr.bf16.mxu1 %v5900_v52 }
 0xbe7   :  { %4215 = vmatpush3.bf16.xpose.msk.msra.mxu1 %vm4769_vm4, %v4213_v11 }
 0xbe8   :  { %4244 = vmatprep.subr.bf16.mxu1 %v5900_v52 }
 0xbee   :  { %3985 = vmatmul.mubr.msk.f32.vlgmr.msra.gmra.mrb[42].mxu1 %vm274_vm2, %v2394_v63 }
 0xbef   :  { %4042 = vmatprep.mubr.msk.f32.mxu1 %vm4511_vm3, %v5901_v27 }
 0xca1   :  { %v3958_v58 = vpop.f32.mrb[42].mxu0 }
 0xca2   :  { %2741 = vperm.xlu0 %4315, %v3958_v58   ;;  %v2622_v4 = vpop.f32.mrb[43].mxu0 }
 0xca3   :  { %2736 = vperm.xlu1 %4316, %v2622_v4  }
 0xca5   :  { %v3961_v17 = vpop.f32.mrb[44].mxu0 }
 0xca6   :  { %v2632_v32 = vpop.f32.mrb[45].mxu0 }
 0xca7   :  { %2746 = vperm.xlu1 %4316, %v2632_v32  }
 0xca9   :  { %v3964_v45 = vpop.f32.mrb[46].mxu0 }
 0xcaa   :  { %v2642_v47 = vpop.f32.mrb[47].mxu0 }
 0xcab   :  { %2751 = vperm.xlu1 %4316, %v3961_v17   ;;  %2756 = vperm.xlu0 %4315, %v2642_v47  }
 0xcad   :  { %v3967_v20 = vpop.f32.mrb[48].mxu0 }
 0xcae   :  { %v2652_v56 = vpop.f32.mrb[49].mxu0 }
 0xcaf   :  { %2761 = vperm.xlu1 %4316, %v3964_v45   ;;  %2766 = vperm.xlu0 %4315, %v2652_v56  }
 0xcb3   :  { %2771 = vperm.xlu1 %4316, %v3967_v20  }
 0xcc1   :  { %v2730_v3 = vpop.f32.mrb[42].mxu1 }
 0xcc2   :  { %v3986_v33 = vpop.f32.mrb[43].mxu1  ;;  %v2777_v19 = vrot.slane %v2730_v3, %v4842_v18 }
 0xd21   :  { %v2742_v48 = vpop.permute.xlu0 %2741 }
 0xd22   :  { %v2779_v25 = vadd.f32 %v2777_v19, %v2742_v48  ;;  %v2737_v14 = vpop.permute.xlu1 %2736 }
 0xd23   :  { %v2778_v36 = vadd.f32 %v2777_v19, %v2737_v14 }
 0xd24   :  { %v2787_v59 = vmul.f32 0.2, %v2779_v25 }
 0xd25   :  { %v2786_v29 = vmul.f32 0.2, %v2778_v36 }
 0xd26   :  { %v2795_v40 = vmax.f32 %v2779_v25, %v2787_v59  ;;  %v2747_v26 = vpop.permute.xlu1 %2746 }
 0xd27   :  { %v2794_v24 = vmax.f32 %v2778_v36, %v2786_v29  ;;  %v2780_v31 = vadd.f32 %v2777_v19, %v2747_v26 }
 0xd28   :  { %v2803_v54 = vadd.f32 %v4485_v37, %v2795_v40 }
 0xd29   :  { %v2788_v53 = vmul.f32 0.2, %v2780_v31  ;;  %v2802_v35 = vadd.f32 %v5331_v9, %v2794_v24 }
 0xd2a   :  { %v2752_v28 = vpop.permute.xlu1 %2751  ;;  %v2757_v18 = vpop.permute.xlu0 %2756  ;;  %v2813_v44 = vsel %vm682_vm5, %v2803_v54, -inf }
 0xd2b   :  { %v2796_v0 = vmax.f32 %v2780_v31, %v2788_v53  ;;  %v2781_v5 = vadd.f32 %v2777_v19, %v2752_v28  ;;  %v2782_v43 = vadd.f32 %v2777_v19, %v2757_v18  ;;  %2814 = vmax.xlane.f32.xlu1 %v2813_v44  ;;  %v2810_v7 = vsel %vm682_vm5, %v2802_v35, -inf }
 0xd2c   :  { %2811 = vmax.xlane.f32.xlu0 %v2810_v7 }
 0xd2d   :  { %v2789_v62 = vmul.f32 0.2, %v2781_v5  ;;  %v2790_v46 = vmul.f32 0.2, %v2782_v43  ;;  %v2804_v38 = vadd.f32 %v5363_v15, %v2796_v0 }
 0xd2e   :  { %v2762_v51 = vpop.permute.xlu1 %2761  ;;  %v2767_v1 = vpop.permute.xlu0 %2766 }
 0xd2f   :  { %v2797_v11 = vmax.f32 %v2781_v5, %v2789_v62  ;;  %v2798_v63 = vmax.f32 %v2782_v43, %v2790_v46  ;;  %v2783_v9 = vadd.f32 %v2777_v19, %v2762_v51  ;;  %v2784_v58 = vadd.f32 %v2777_v19, %v2767_v1 }
 0xd30   :  { %v2816_v4 = vsel %vm682_vm5, %v2804_v38, -inf }
 0xd31   :  { %v2791_v17 = vmul.f32 0.2, %v2783_v9  ;;  %v2792_v32 = vmul.f32 0.2, %v2784_v58  ;;  %2817 = vmax.xlane.f32.xlu0 %v2816_v4  ;;  %v2806_v45 = vadd.f32 %v5386_v34, %v2798_v63  ;;  %v2805_v47 = vadd.f32 %v5354_v23, %v2797_v11 }
 0xd32   :  { %v2772_v20 = vpop.permute.xlu1 %2771 }
 0xd33   :  { %v2799_v56 = vmax.f32 %v2783_v9, %v2791_v17  ;;  %v2800_v3 = vmax.f32 %v2784_v58, %v2792_v32  ;;  %v2785_v33 = vadd.f32 %v2777_v19, %v2772_v20  ;;  %v2822_v15 = vsel %vm682_vm5, %v2806_v45, -inf }
 0xd34   :  { %2823 = vmax.xlane.f32.xlu1 %v2822_v15  ;;  %v2819_v48 = vsel %vm682_vm5, %v2805_v47, -inf }
 0xd35   :  { %v2793_v25 = vmul.f32 0.2, %v2785_v33  ;;  %2820 = vmax.xlane.f32.xlu0 %v2819_v48  ;;  %v2807_v14 = vadd.f32 %v5371_v42, %v2799_v56  ;;  %v2808_v36 = vadd.f32 %v5428_v30, %v2800_v3 }
 0xd37   :  { %v2801_v59 = vmax.f32 %v2785_v33, %v2793_v25  ;;  %v2825_v34 = vsel %vm682_vm5, %v2807_v14, -inf  ;;  %v2828_v23 = vsel %vm682_vm5, %v2808_v36, -inf }
 0xd38   :  { %2829 = vmax.xlane.f32.xlu1 %v2828_v23 }
 0xd39   :  { %2826 = vmax.xlane.f32.xlu0 %v2825_v34  ;;  %v2809_v19 = vadd.f32 %v5396_v39, %v2801_v59 }
 0xd3b   :  { %v2831_v29 = vsel %vm682_vm5, %v2809_v19, -inf }
 0xd3d   :  { %2832 = vmax.xlane.f32.xlu0 %v2831_v29 }
 0xdb8   :  { %v2815_v40 = vpop.xlane.xlu1 %2814 }
 0xdb9   :  { %v2835_v26 = vsub.f32 %v2803_v54, %v2815_v40  ;;  %v2812_v24 = vpop.xlane.xlu0 %2811 }
 0xdba   :  { %v2834_v31 = vsub.f32 %v2802_v35, %v2812_v24 }
 0xdbb   :  { %v2844_v37 = vmul.f32 1.442695, %v2835_v26 }
 0xdbc   :  { %v2842_v42 = vmul.f32 1.442695, %v2834_v31 }
 0xdbd   :  { %4445 = vpow2.f32 %v2844_v37 }
 0xdbe   :  { %4447 = vpow2.f32 %v2842_v42  ;;  %v2818_v30 = vpop.xlane.xlu0 %2817 }
 0xdbf   :  { %v2836_v53 = vsub.f32 %v2804_v38, %v2818_v30 }
 0xdc1   :  { %v2846_v28 = vmul.f32 1.442695, %v2836_v53  ;;  %v2824_v18 = vpop.xlane.xlu1 %2823 }
 0xdc2   :  { %v2838_v44 = vsub.f32 %v2806_v45, %v2824_v18  ;;  %v2821_v0 = vpop.xlane.xlu0 %2820 }
 0xdc3   :  { %4449 = vpow2.f32 %v2846_v28  ;;  %v2837_v5 = vsub.f32 %v2805_v47, %v2821_v0 }
 0xdc4   :  { %v2850_v39 = vmul.f32 1.442695, %v2838_v44 }
 0xdc5   :  { %v2848_v43 = vmul.f32 1.442695, %v2837_v5  ;;  %v2830_v7 = vpop.xlane.xlu1 %2829 }
 0xdc6   :  { %4451 = vpow2.f32 %v2850_v39  ;;  %v2840_v62 = vsub.f32 %v2808_v36, %v2830_v7  ;;  %v2827_v54 = vpop.xlane.xlu0 %2826 }
 0xdc7   :  { %v4446_v46 = vpop.eup %4445  ;;  %4453 = vpow2.f32 %v2848_v43  ;;  %v2839_v35 = vsub.f32 %v2807_v14, %v2827_v54 }
 0xdc8   :  { %v4448_v51 = vpop.eup %4447  ;;  %v2854_v1 = vmul.f32 1.442695, %v2840_v62  ;;  %v2861_v11 = vsel %vm682_vm5, %v4446_v46, 0.0 }
 0xdc9   :  { %v2852_v38 = vmul.f32 1.442695, %v2839_v35  ;;  %2862 = vadd.xlane.f32.xlu0 %v2861_v11  ;;  %v2858_v63 = vsel %vm682_vm5, %v4448_v51, 0.0  ;;  %v3154_v35 = vld [vmem:[%s5902_s30 + $0x8] sm:$0xff]  ;;  %v3156_v11 = vld [vmem:[%s5902_s30 + $0x18] sm:$0xff] }
 0xdca   :  { %4455 = vpow2.f32 %v2854_v1  ;;  %v2833_v9 = vpop.xlane.xlu0 %2832  ;;  %2859 = vadd.xlane.f32.xlu1 %v2858_v63  ;;  %v3470_v63 = vld [vmem:[%s5857_s26] ss:$0 sm:$0xff] }
 0xdcb   :  { %4457 = vpow2.f32 %v2852_v38  ;;  %v2841_v58 = vsub.f32 %v2809_v19, %v2833_v9 }
 0xdcd   :  { %v4450_v4 = vpop.eup %4449  ;;  %v2856_v17 = vmul.f32 1.442695, %v2841_v58 }
 0xdce   :  { %v2864_v32 = vsel %vm682_vm5, %v4450_v4, 0.0 }
 0xdcf   :  { %4459 = vpow2.f32 %v2856_v17  ;;  %2865 = vadd.xlane.f32.xlu1 %v2864_v32  ;;  %v3471_v17 = vld [vmem:[%s5858_s27] ss:$0 sm:$0xff] }
 0xdd0   :  { %v4452_v45 = vpop.eup %4451 }
 0xdd1   :  { %v4454_v47 = vpop.eup %4453  ;;  %v2870_v20 = vsel %vm682_vm5, %v4452_v45, 0.0 }
 0xdd2   :  { %v2867_v56 = vsel %vm682_vm5, %v4454_v47, 0.0 }
 0xdd3   :  { %2871 = vadd.xlane.f32.xlu1 %v2870_v20  ;;  %2868 = vadd.xlane.f32.xlu0 %v2867_v56 }
 0xdd4   :  { %v4456_v3 = vpop.eup %4455 }
 0xdd5   :  { %v4458_v33 = vpop.eup %4457  ;;  %v2876_v15 = vsel %vm682_vm5, %v4456_v3, 0.0 }
 0xdd6   :  { %v2873_v48 = vsel %vm682_vm5, %v4458_v33, 0.0 }
 0xdd7   :  { %2877 = vadd.xlane.f32.xlu1 %v2876_v15  ;;  %2874 = vadd.xlane.f32.xlu0 %v2873_v48 }
 0xdd9   :  { %v4460_v25 = vpop.eup %4459 }
 0xdda   :  { %v2879_v14 = vsel %vm682_vm5, %v4460_v25, 0.0 }
 0xddb   :  { %2880 = vadd.xlane.f32.xlu0 %v2879_v14 }
 0xe56   :  { %v2863_v36 = vpop.xlane.xlu0 %2862 }
 0xe57   :  { %4461 = vrcp.f32 %v2863_v36  ;;  %v2860_v59 = vpop.xlane.xlu1 %2859 }
 0xe58   :  { %4463 = vrcp.f32 %v2860_v59 }
 0xe5c   :  { %v2866_v34 = vpop.xlane.xlu1 %2865 }
 0xe5d   :  { %4465 = vrcp.f32 %v2866_v34 }
 0xe60   :  { %v2872_v23 = vpop.xlane.xlu1 %2871  ;;  %v2869_v19 = vpop.xlane.xlu0 %2868 }
 0xe61   :  { %v4462_v29 = vpop.eup %4461  ;;  %4467 = vrcp.f32 %v2872_v23 }
 0xe62   :  { %v4464_v40 = vpop.eup %4463  ;;  %4469 = vrcp.f32 %v2869_v19  ;;  %v2891_v24 = vmul.f32 %v4462_v29, %v4446_v46  ;;  %v3153_v46 = vld [vmem:[%s5902_s30] sm:$0xff] }
 0xe63   :  { %v2890_v26 = vmul.f32 %v4464_v40, %v4448_v51  ;;  %v3155_v51 = vld [vmem:[%s5902_s30 + $0x10] sm:$0xff]  ;;  %v4245_v1 = vpack.c.bf16 %v3154_v35, %v3153_v46  ;;  %s3330_s30 = sshll.u32 %s4517_s18, 4  ;;  %s3331_s30 = int_to_ptr.vmem [resolvable:$true] %s3330_s30 }
 0xe64   :  { %v2878_v31 = vpop.xlane.xlu1 %2877  ;;  %v2875_v37 = vpop.xlane.xlu0 %2874  ;;  %v4248_v38 = vpack.c.bf16 %v3156_v11, %v3155_v51  ;;  %v3240_v11 = vld [vmem:[%s5904_s29 + $0x10] sm:$0xff]  ;;  %s4486_s7 = scalar_lea.vmem %s3331_s30, 32  ;;  %p4491_p1 = scmp.lt.s32.totalorder %s3331_s30, %s3331_s30 }
 0xe65   :  { %4471 = vrcp.f32 %v2878_v31  ;;  %4003 = vmatprep.mubr.msk.f32.mxu0 %vm682_vm5, %v2890_v26  ;;  %4246 = vmatpush3.bf16.msra.mxu1 %v4245_v1  ;;  %p4487_p0 = scmp.ne.s32.totalorder %s3331_s30, %s4486_s7  ;;  %p4492_p2 = scmp.lt.s32.totalorder %s4486_s7, %s4486_s7 }
 0xe66   :  { %4473 = vrcp.f32 %v2875_v37  ;;  %4004 = vmatmul.mubr.msk.f32.vlgmr.msra.gmra.mrb[50].mxu0 %vm682_vm5, %v2891_v24  ;;  %4247 = vmatprep.subr.bf16.mxu1 %v5900_v52 }
 0xe67   :  { %v4466_v42 = vpop.eup %4465  ;;  %p4493_p3 = por %p4492_p2, %p4491_p1 }
 0xe68   :  { %v2881_v30 = vpop.xlane.xlu0 %2880  ;;  %v2892_v53 = vmul.f32 %v4466_v42, %v4450_v4 }
 0xe69   :  { %4475 = vrcp.f32 %v2881_v30  ;;  %4249 = vmatpush3.bf16.msra.mxu1 %v4248_v38  ;;  %v3241_v38 = vld [vmem:[%s5904_s29 + $0x18] sm:$0xff]  ;;  %p4494_p4 = pnand %p4493_p3, %p4487_p0 }
 0xe6a   :  { %4006 = vmatprep.mubr.msk.f32.mxu0 %vm682_vm5, %v2892_v53  ;;  %4250 = vmatprep.subr.bf16.mxu1 %v5900_v52 }
 0xe6b   :  { %v4468_v28 = vpop.eup %4467 }
 0xe6c   :  { %v4470_v18 = vpop.eup %4469  ;;  %v2894_v44 = vmul.f32 %v4468_v28, %v4452_v45 }
 0xe6d   :  { %v2893_v0 = vmul.f32 %v4470_v18, %v4454_v47 }
 0xe6f   :  { %v4472_v5 = vpop.eup %4471  ;;  %4007 = vmatmul.mubr.msk.f32.gmra.mrb[52].mxu0 %vm682_vm5, %v2893_v0 }
 0xe70   :  { %v4474_v39 = vpop.eup %4473  ;;  %4009 = vmatprep.mubr.msk.f32.mxu0 %vm682_vm5, %v2894_v44  ;;  %v2896_v43 = vmul.f32 %v4472_v5, %v4456_v3 }
 0xe71   :  { %v2895_v7 = vmul.f32 %v4474_v39, %v4458_v33 }
 0xe73   :  { %v4476_v62 = vpop.eup %4475  ;;  %4010 = vmatmul.mubr.msk.f32.gmra.mrb[54].mxu0 %vm682_vm5, %v2895_v7 }
 0xe74   :  { %4012 = vmatprep.mubr.msk.f32.mxu0 %vm682_vm5, %v2896_v43  ;;  %v2897_v54 = vmul.f32 %v4476_v62, %v4460_v25 }
 0xe77   :  { %4013 = vmatmul.mubr.msk.f32.gmra.mrb[56].mxu0 %vm682_vm5, %v2897_v54 }
 0xe78   :  { %4031 = vmatprep.mubr.msk.f32.mxu0 %vm4511_vm3, %v5901_v27 }
 0xf39   :  { %v4005_v9 = vpop.f32.mrb[50].mxu0 }
 0xf3a   :  { %v3028_v58 = vmul.f32 %v4005_v9, %v5156_v55  ;;  %v2988_v4 = vpop.f32.mrb[51].mxu0  ;;  %v3473_v9 = vld [vmem:[%s5905_s0] ss:$0 sm:$0xff] }
 0xf3b   :  { %v3027_v32 = vmul.f32 %v2988_v4, %v5150_v41 }
 0xf3c   :  { %v3042_v45 = vmul.f32 %v3470_v63, %v3028_v58 }
 0xf3d   :  { %v3041_v47 = vmul.f32 %v3470_v63, %v3027_v32 }
 0xf3e   :  { %v3056_v20 = vadd.f32 %v3471_v17, %v3042_v45 }
 0xf3f   :  { %v3055_v56 = vadd.f32 %v3471_v17, %v3041_v47 }
 0xf40   :  { %v3064_v3 = vmax.f32 %v3056_v20, 0.0 }
 0xf41   :  { %v3063_v33 = vmax.f32 %v3055_v56, 0.0 }
 0xf42   :  { %v3072_v15 = vadd.f32 %v3064_v3, %v5644_v12  ;;  %v4008_v48 = vpop.f32.mrb[52].mxu0 }
 0xf43   :  { %v3071_v25 = vadd.f32 %v3063_v33, %v5641_v50  ;;  %v3030_v55 = vmul.f32 %v4008_v48, %v5154_v2  ;;  %v2998_v14 = vpop.f32.mrb[53].mxu0 }
 0xf44   :  { %v3029_v36 = vmul.f32 %v2998_v14, %v5152_v10 }
 0xf45   :  { %v3044_v59 = vmul.f32 %v3470_v63, %v3030_v55  ;;  %v4233_v34 = vpack.c.bf16 %v3072_v15, %v3071_v25 }
 0xf46   :  { %v3043_v23 = vmul.f32 %v3470_v63, %v3029_v36  ;;  %v4011_v41 = vpop.f32.mrb[54].mxu0 }
 0xf47   :  { %v3058_v19 = vadd.f32 %v3471_v17, %v3044_v59  ;;  %v3032_v29 = vmul.f32 %v4011_v41, %v5158_v57  ;;  %v3008_v40 = vpop.f32.mrb[55].mxu0  ;;  %4234 = vmatpush3.bf16.msra.mxu0 %v4233_v34 }
 0xf48   :  { %v3057_v26 = vadd.f32 %v3471_v17, %v3043_v23  ;;  %v3031_v12 = vmul.f32 %v3008_v40, %v5160_v60  ;;  %4235 = vmatprep.subr.bf16.mxu0 %v5900_v52 }
 0xf49   :  { %v3066_v50 = vmax.f32 %v3058_v19, 0.0  ;;  %v3046_v24 = vmul.f32 %v3470_v63, %v3032_v29 }
 0xf4a   :  { %v3065_v2 = vmax.f32 %v3057_v26, 0.0  ;;  %v3045_v31 = vmul.f32 %v3470_v63, %v3031_v12  ;;  %v4014_v37 = vpop.f32.mrb[56].mxu0 }
 0xf4b   :  { %v3074_v10 = vadd.f32 %v3066_v50, %v5660_v8  ;;  %v3060_v42 = vadd.f32 %v3471_v17, %v3046_v24  ;;  %v3034_v30 = vmul.f32 %v4014_v37, %v5162_v61  ;;  %v3018_v53 = vpop.f32.mrb[57].mxu0 }
 0xf4c   :  { %v3073_v57 = vadd.f32 %v3065_v2, %v5657_v6  ;;  %v3059_v28 = vadd.f32 %v3471_v17, %v3045_v31  ;;  %v3033_v18 = vmul.f32 %v3018_v53, %v5164_v49 }
 0xf4d   :  { %v3068_v44 = vmax.f32 %v3060_v42, 0.0  ;;  %v3048_v60 = vmul.f32 %v3470_v63, %v3034_v30 }
 0xf4e   :  { %v3067_v0 = vmax.f32 %v3059_v28, 0.0  ;;  %v3047_v5 = vmul.f32 %v3470_v63, %v3033_v18  ;;  %v4236_v39 = vpack.c.bf16 %v3074_v10, %v3073_v57  ;;  %v4254_v63 = vpack.c.bf16 %v3241_v38, %v3240_v11 }
 0xf4f   :  { %v3076_v43 = vadd.f32 %v3068_v44, %v5670_v21  ;;  %v3062_v7 = vadd.f32 %v3471_v17, %v3048_v60  ;;  %v3238_v21 = vld [vmem:[%s5904_s29] sm:$0xff] }
 0xf50   :  { %v3075_v62 = vadd.f32 %v3067_v0, %v5667_v22  ;;  %v3061_v8 = vadd.f32 %v3471_v17, %v3047_v5  ;;  %4237 = vmatpush3.bf16.msra.mxu0 %v4236_v39  ;;  %v3079_v22 = vld [vmem:[%s5903_s10] sm:$0x3] }
 0xf51   :  { %v3070_v54 = vmax.f32 %v3062_v7, 0.0  ;;  %4238 = vmatprep.subr.bf16.mxu0 %v5900_v52 }
 0xf52   :  { %v3069_v61 = vmax.f32 %v3061_v8, 0.0  ;;  %v4239_v6 = vpack.c.bf16 %v3076_v43, %v3075_v62 }
 0xf53   :  { %v3078_v46 = vadd.f32 %v3070_v54, %v5680_v16  ;;  %v3239_v16 = vld [vmem:[%s5904_s29 + $0x8] sm:$0xff] }
 0xf54   :  { %v3077_v49 = vadd.f32 %v3069_v61, %v5677_v13  ;;  %4240 = vmatpush3.bf16.msra.mxu0 %v4239_v6  ;;  %v4251_v13 = vpack.c.bf16 %v3239_v16, %v3238_v21 }
 0xf55   :  { %4241 = vmatprep.subr.bf16.mxu0 %v5900_v52 }
 0xf56   :  { %v4242_v35 = vpack.c.bf16 %v3078_v46, %v3077_v49 }
 0xf58   :  { %4243 = vmatpush3.bf16.msra.mxu0 %v4242_v35 }
 0xf5b   :  { %4032 = vmatmul.mubr.msk.f32.vlgmr.msra.gmra.mrb[58].mxu0 %vm682_vm5, %v3079_v22 }
0x102e   :  { %v3149_v51 = vpop.f32.mrb[58].mxu0 }
0x102f   :  { %v4033_v1 = vpop.f32.mrb[59].mxu0  ;;  %4043 = vmatmul.mubr.msk.f32.vlgmr.msra.gmra.mrb[44].mxu1 %vm274_vm2, %v3149_v51 }
0x1030   :  { %4252 = vmatpush3.bf16.msra.mxu1 %v4251_v13  ;;  %4053 = vmatprep.mubr.msk.f32.mxu1 %vm4511_vm3, %v5901_v27 }
0x1031   :  { %4253 = vmatprep.subr.bf16.mxu1 %v5900_v52  ;;  %v3475_v52 = vld [vmem:[%s5906_s3] ss:$0 sm:$0xff] }
0x1034   :  { %4255 = vmatpush3.bf16.msra.mxu1 %v4254_v63 }
0x1102   :  { %v3233_v58 = vpop.f32.mrb[44].mxu1 }
0x1103   :  { %v3234_v4 = vadd.f32 %v3473_v9, %v3233_v58  ;;  %v4044_v17 = vpop.f32.mrb[45].mxu1 }
0x1105   :  { %v3237_v27 = vmax.f32 %v3234_v4, 0.0 }
0x1107   :  { %4054 = vmatmul.mubr.msk.f32.vlgmr.msra.gmra.mrb[46].mxu1 %vm274_vm2, %v3237_v27 }
0x11da   :  { %v3318_v32 = vpop.f32.mrb[46].mxu1 }
0x11db   :  { %v3319_v45 = vadd.f32 %v3475_v52, %v3318_v32  ;;  %v4055_v47 = vpop.f32.mrb[47].mxu1 }
0x11dd   :  { %3323 = vst.msk [vmem:[#allocation2] sm:$0x3] %vm3322_vm7, %v3319_v45 }
0x11de   :  { %4497 = shalt.err (!%p4494_p4)
}
0x11df   :  { %s4498_s19 = scalar_lea.hbm %s5859_s28, 32 }
0x11e0   :  { %p4499_p5 = scmp.ne.s32.totalorder %s5859_s28, %s4498_s19  ;;  %p4502_p6 = scmp.lt.u32.totalorder %s4498_s19, %s5859_s28 }
0x11e2   :  { %p4504_p7 = pnand %p4502_p6, %p4499_p5 }
0x11e4   :  { %4507 = shalt.err (!%p4504_p7)
}
0x11e5   :  { %3333 = dma.vmem_to_hbm [thread:$0]  %s3331_s30, 32, %s5859_s28, [#allocation3]  }
0x11e6   :  { %4508 = dma.done.wait [#allocation3], 32  }
0x11e7   :  { %4509 = vsyncadd [#allocation3], 4294967264 }
0x11e8   :  { %3337 = vsyncpa [#allocation3], 1 }

</bundles_post_ra>
